<compile_context>
chip_gen: v7x
topology: tpu7x:2x2x1
jax: 0.10.0
libtpu: 0.0.40
codegen_flags: <defaults>
</compile_context>

<pallas_src>
import math
import functools

import jax
import jax.numpy as jnp
import numpy as np
from jax import lax
from jax.experimental import pallas as pl
from jax.experimental.pallas import tpu as pltpu


def _round_up(x, m):
    return ((x + m - 1) // m) * m


def _make_kernel(hidden_pad, block_t, seq_len, mask_tail, matmul_dtype,
                 use_fori):
    """Builds the time-blocked recurrent kernel (time-major layout)."""
    Hp = hidden_pad

    def kernel(xproj_ref, whh_ref, hall_ref, cn_ref, h_sc, c_sc):
        g = pl.program_id(0)

        @pl.when(g == 0)
        def _init():
            h_sc[...] = jnp.zeros_like(h_sc)
            c_sc[...] = jnp.zeros_like(c_sc)

        def step(t, carry):
            h, c = carry
            xp_t = xproj_ref[t]                                   # (Np, 4Hp) f32
            h_mm = h if matmul_dtype is None else h.astype(matmul_dtype)
            # W_hh^T consumed straight from the VMEM ref (no hoisted copy).
            gates = xp_t + jnp.dot(h_mm, whh_ref[...],
                                   preferred_element_type=jnp.float32)
            # i/f/o pre-activations were pre-scaled by 0.5 in the wrapper, so a
            # single tanh over the whole gate tensor covers all four gates.
            tg = jnp.tanh(gates)                                  # one EUP launch
            i_g = 0.5 * tg[:, 0 * Hp:1 * Hp] + 0.5
            f_g = 0.5 * tg[:, 1 * Hp:2 * Hp] + 0.5
            g_g = tg[:, 2 * Hp:3 * Hp]
            o_g = 0.5 * tg[:, 3 * Hp:4 * Hp] + 0.5

            c_new = f_g * c + i_g * g_g
            h_new = o_g * jnp.tanh(c_new)

            if mask_tail:
                # Padded tail timesteps: freeze the carry so h_n/c_n stay right.
                valid = (g * block_t + t) < seq_len
                h_new = jnp.where(valid, h_new, h)
                c_new = jnp.where(valid, c_new, c)

            hall_ref[t] = h_new.astype(hall_ref.dtype)            # dense (Np,Hp) store
            return h_new, c_new

        carry0 = (h_sc[...], c_sc[...])
        if use_fori:
            h, c = lax.fori_loop(0, block_t, step, carry0,
                                 unroll=min(block_t, 8))
        else:
            h, c = carry0
            for t in range(block_t):                              # fully unrolled
                h, c = step(t, (h, c))

        h_sc[...] = h
        c_sc[...] = c

        @pl.when(g == pl.num_programs(0) - 1)
        def _final():
            cn_ref[0] = c.astype(cn_ref.dtype)

    return kernel


@functools.partial(jax.jit, static_argnames=("block_t", "matmul_dtype"))
def dp_fast_lstm_forward(x, weight_ih, weight_hh, bias=None, *,
                         block_t=None, matmul_dtype=jnp.bfloat16):
    """x: (N, L, I) batch_first. Returns (h_all (N,L,H), (h_n, c_n) each (1,N,H))."""
    N, L, I = x.shape
    H = weight_ih.shape[0] // 4
    out_dtype = x.dtype
    out_itemsize = jnp.dtype(out_dtype).itemsize

    # ---- pad hidden to a lane multiple and batch to a sublane multiple. ----
    Hp = _round_up(H, 128)
    n_sub = 8 * max(1, 4 // out_itemsize)          # 8 for f32, 16 for bf16, ...
    Np = _round_up(N, n_sub)

    def gate_pad_rows(w):
        # Pad each of the 4 gate blocks of H rows up to Hp rows.
        if Hp == H:
            return w
        w4 = w.reshape((4, H) + w.shape[1:])
        pad = [(0, 0), (0, Hp - H)] + [(0, 0)] * (w.ndim - 1)
        return jnp.pad(w4, pad).reshape((4 * Hp,) + w.shape[1:])

    w_ih_p = gate_pad_rows(weight_ih)                           # (4Hp, I)
    w_hh_p = gate_pad_rows(weight_hh)                           # (4Hp, H)
    if Hp != H:
        w_hh_p = jnp.pad(w_hh_p, ((0, 0), (0, Hp - H)))         # (4Hp, Hp)
    b_p = None if bias is None else gate_pad_rows(bias)         # (4Hp,)

    # Pre-scale i/f/o rows by 0.5 (sigmoid(z) == 0.5*tanh(z/2)+0.5) so the
    # kernel needs a single tanh per step over the full gate tensor.
    half = jnp.full((Hp,), 0.5, jnp.float32)
    one = jnp.ones((Hp,), jnp.float32)
    scale = jnp.concatenate([half, half, one, half])            # (4Hp,)
    w_ih_s = w_ih_p.astype(jnp.float32) * scale[:, None]
    w_hh_s = w_hh_p.astype(jnp.float32) * scale[:, None]
    b_s = None if b_p is None else b_p.astype(jnp.float32) * scale

    # ---- Stage 1 (parallel): time-major input projection (L, Np, 4Hp) f32. ----
    x_p = x if Np == N else jnp.pad(x, ((0, Np - N), (0, 0), (0, 0)))
    x_mm = x_p if matmul_dtype is None else x_p.astype(matmul_dtype)
    wih_mm = w_ih_s if matmul_dtype is None else w_ih_s.astype(matmul_dtype)
    x_proj = jnp.einsum("nli,gi->lng", x_mm, wih_mm,
                        preferred_element_type=jnp.float32)     # (L, Np, 4Hp)
    if b_s is not None:
        x_proj = x_proj + b_s[None, None, :]
    # TODO(synk): optionally stream x_proj in bf16 to halve HBM traffic when
    # the accuracy budget allows (kept f32 here for exactness).

    whh_t = jnp.transpose(w_hh_s, (1, 0))                       # (Hp, 4Hp)
    if matmul_dtype is not None:
        whh_t = whh_t.astype(matmul_dtype)

    # ---- pick block_t against an explicit double-buffered VMEM budget. ----
    if block_t is None:
        budget = 18 * 1024 * 1024
        per_t = 2 * (Np * 4 * Hp * 4) + 2 * (Np * Hp * out_itemsize)
        whh_bytes = Hp * 4 * Hp * (2 if matmul_dtype is not None else 4)
        fixed = 2 * whh_bytes + 2 * Np * Hp * 4 + 2 * Np * Hp * out_itemsize
        bt = max(8, (budget - fixed) // max(per_t, 1))
        bt = min(bt, 128, _round_up(L, 8))
        block_t = max(8, (bt // 8) * 8)
    assert block_t % 8 == 0, "block_t must be a multiple of 8"

    num_blocks = pl.cdiv(L, block_t)
    Lp = num_blocks * block_t
    if Lp != L:
        x_proj = jnp.pad(x_proj, ((0, Lp - L), (0, 0), (0, 0)))

    kernel = _make_kernel(Hp, block_t, L, Lp != L, matmul_dtype,
                          use_fori=(block_t > 16))

    # ---- Stage 2 (serial recurrence): block_t timesteps per grid step. ----
    h_all_tm, c_n_p = pl.pallas_call(
        kernel,
        out_shape=(
            jax.ShapeDtypeStruct((Lp, Np, Hp), out_dtype),   # h_all (time-major)
            jax.ShapeDtypeStruct((1, Np, Hp), out_dtype),    # c_n
        ),
        grid_spec=pltpu.PrefetchScalarGridSpec(
            num_scalar_prefetch=0,
            grid=(num_blocks,),
            in_specs=[
                pl.BlockSpec((block_t, Np, 4 * Hp), lambda i: (i, 0, 0)),  # x_proj
                pl.BlockSpec((Hp, 4 * Hp), lambda i: (0, 0)),              # W_hh^T
            ],
            out_specs=[
                pl.BlockSpec((block_t, Np, Hp), lambda i: (i, 0, 0)),      # h_all
                pl.BlockSpec((1, Np, Hp), lambda i: (0, 0, 0)),            # c_n
            ],
            scratch_shapes=[
                pltpu.VMEM((Np, Hp), jnp.float32),   # h carry
                pltpu.VMEM((Np, Hp), jnp.float32),   # c carry
            ],
        ),
        compiler_params=pltpu.CompilerParams(
            dimension_semantics=("arbitrary",),      # sequential time recurrence
            vmem_limit_bytes=32 * 1024 * 1024,
        ),
    )(x_proj, whh_t)

    # TODO(synk): on v7x, shard the batch axis across the 2 TensorCores with a
    # leading ("parallel") grid axis when N is large enough (>= 16 per core).

    h_all = jnp.transpose(h_all_tm[:L, :N, :H], (1, 0, 2))      # (N, L, H)
    c_n = c_n_p[:, :N, :H]                                      # (1, N, H)
    h_n = h_all[:, L - 1, :][None]                              # (1, N, H)
    return h_all, (h_n, c_n)
    # TODO(synk): bidirectional=True reverse pass and user-provided (h_0, c_0)
    # state are not implemented; module defaults are bidirectional=False,
    # state=None (zero init).


def _lstm_reference(x, weight_ih, weight_hh, bias):
    """Pure-JAX reference (lax.scan) mirroring torch LSTM gate semantics."""
    N, L, I = x.shape
    H = weight_ih.shape[0] // 4

    def step(carry, x_t):
        h, c = carry
        gates = x_t @ weight_ih.T + h @ weight_hh.T + bias
        i_g = jax.nn.sigmoid(gates[:, 0 * H:1 * H])
        f_g = jax.nn.sigmoid(gates[:, 1 * H:2 * H])
        g_g = jnp.tanh(gates[:, 2 * H:3 * H])
        o_g = jax.nn.sigmoid(gates[:, 3 * H:4 * H])
        c_new = f_g * c + i_g * g_g
        h_new = o_g * jnp.tanh(c_new)
        return (h_new, c_new), h_new

    h0 = jnp.zeros((N, H), x.dtype)
    c0 = jnp.zeros((N, H), x.dtype)
    (h_n, c_n), hs = jax.lax.scan(step, (h0, c0), jnp.transpose(x, (1, 0, 2)))
    return jnp.transpose(hs, (1, 0, 2)), (h_n[None], c_n[None])


if __name__ == "__main__":
    def run_case(key, N, L, I, H, block_t, matmul_dtype, atol, rtol):
        stdv = 1.0 / math.sqrt(H)   # matches reset_parameters(): U(-1/sqrt(H), 1/sqrt(H))
        kx, kih, khh, kb = jax.random.split(key, 4)
        x = jax.random.normal(kx, (N, L, I), dtype=jnp.float32)
        weight_ih = jax.random.uniform(kih, (4 * H, I), jnp.float32, -stdv, stdv)
        weight_hh = jax.random.uniform(khh, (4 * H, H), jnp.float32, -stdv, stdv)
        bias = jax.random.uniform(kb, (4 * H,), jnp.float32, -stdv, stdv)

        h_all, (h_n, c_n) = dp_fast_lstm_forward(
            x, weight_ih, weight_hh, bias,
            block_t=block_t, matmul_dtype=matmul_dtype)
        jax.block_until_ready((h_all, h_n, c_n))

        ref_h_all, (ref_h_n, ref_c_n) = _lstm_reference(x, weight_ih, weight_hh, bias)
        np.testing.assert_allclose(np.asarray(h_all), np.asarray(ref_h_all),
                                   atol=atol, rtol=rtol)
        np.testing.assert_allclose(np.asarray(h_n), np.asarray(ref_h_n),
                                   atol=atol, rtol=rtol)
        np.testing.assert_allclose(np.asarray(c_n), np.asarray(ref_c_n),
                                   atol=atol, rtol=rtol)
        assert h_all.shape == (N, L, H)
        assert h_n.shape == (1, N, H) and c_n.shape == (1, N, H)

    key = jax.random.PRNGKey(0)
    k1, k2, k3, k4 = jax.random.split(key, 4)

    # Case 1: batch=2, seq=8, input=16, hidden=32 -> single grid step, f32 exact.
    run_case(k1, N=2, L=8, I=16, H=32, block_t=8, matmul_dtype=None,
             atol=2e-5, rtol=2e-5)
    # Case 2: seq=12 with block_t=8 -> carry across grid steps + masked padded
    # tail (Lp=16), f32 exact.
    run_case(k2, N=2, L=12, I=16, H=32, block_t=8, matmul_dtype=None,
             atol=2e-5, rtol=2e-5)
    # Case 3: odd batch (padded to 8), seq=40, adaptive block_t (>16 -> fori
    # inner loop), f32 exact.
    run_case(k3, N=3, L=40, I=16, H=32, block_t=None, matmul_dtype=None,
             atol=5e-5, rtol=5e-5)
    # Case 4: default perf mode (bf16 MXU operands, f32 accumulate/carries).
    run_case(k4, N=4, L=24, I=16, H=32, block_t=8, matmul_dtype=jnp.bfloat16,
             atol=5e-2, rtol=5e-2)

    print("KERNEL_OK")
</pallas_src>

<mosaic_0001>
module attributes {stable_mosaic.version = 11 : i64} {
  func.func @kernel(%arg0: i32, %arg1: memref<8x8x512xf32, #tpu.memory_space<vmem>>, %arg2: memref<128x512xf32, #tpu.memory_space<vmem>>, %arg3: memref<8x8x128xf32, #tpu.memory_space<vmem>>, %arg4: memref<1x8x128xf32, #tpu.memory_space<vmem>>, %arg5: memref<8x128xf32, #tpu.memory_space<vmem>>, %arg6: memref<8x128xf32, #tpu.memory_space<vmem>>) attributes {dimension_semantics = [#tpu.dimension_semantics<arbitrary>], iteration_bounds = array<i64: 1>, scalar_prefetch = 0 : i64, scratch_operands = 2 : i64, tpu.core_type = #tpu.core_type<tc>, window_params = [{transform_indices = @transform_0, window_bounds = array<i64: 8, 8, 512>}, {pipeline_mode = #tpu.pipeline_mode<synchronous>, transform_indices = @transform_1, window_bounds = array<i64: 128, 512>}, {transform_indices = @transform_2, window_bounds = array<i64: 8, 8, 128>}, {pipeline_mode = #tpu.pipeline_mode<synchronous>, transform_indices = @transform_3, window_bounds = array<i64: 1, 8, 128>}]} {
    %c0_i32 = arith.constant 0 : i32
    %0 = arith.cmpi eq, %arg0, %c0_i32 : i32
    %1 = arith.extui %0 : i1 to i32
    %c0_i32_0 = arith.constant 0 : i32
    %2 = arith.cmpi ne, %1, %c0_i32_0 : i32
    scf.if %2 {
      %cst_122 = arith.constant 0.000000e+00 : f32
      %250 = vector.broadcast %cst_122 : f32 to vector<8x128xf32>
      %c0_123 = arith.constant 0 : index
      %c0_124 = arith.constant 0 : index
      %251 = vector.load %arg5[%c0_123, %c0_124] : memref<8x128xf32, #tpu.memory_space<vmem>>, vector<8x128xf32>
      tpu.vector_store %arg5[%c0_123, %c0_124], %250 {strides = array<i32>} : memref<8x128xf32, #tpu.memory_space<vmem>>, vector<8x128xf32>,
      %cst_125 = arith.constant 0.000000e+00 : f32
      %252 = vector.broadcast %cst_125 : f32 to vector<8x128xf32>
      %c0_126 = arith.constant 0 : index
      %c0_127 = arith.constant 0 : index
      %253 = vector.load %arg6[%c0_126, %c0_127] : memref<8x128xf32, #tpu.memory_space<vmem>>, vector<8x128xf32>
      tpu.vector_store %arg6[%c0_126, %c0_127], %252 {strides = array<i32>} : memref<8x128xf32, #tpu.memory_space<vmem>>, vector<8x128xf32>,
    } else {
    }
    %c0 = arith.constant 0 : index
    %c0_1 = arith.constant 0 : index
    %3 = vector.load %arg5[%c0, %c0_1] : memref<8x128xf32, #tpu.memory_space<vmem>>, vector<8x128xf32>
    %c0_2 = arith.constant 0 : index
    %c0_3 = arith.constant 0 : index
    %4 = vector.load %arg6[%c0_2, %c0_3] : memref<8x128xf32, #tpu.memory_space<vmem>>, vector<8x128xf32>
    %c0_4 = arith.constant 0 : index
    %c0_5 = arith.constant 0 : index
    %c0_6 = arith.constant 0 : index
    %5 = vector.load %arg1[%c0_4, %c0_5, %c0_6] : memref<8x8x512xf32, #tpu.memory_space<vmem>>, vector<1x8x512xf32>
    %6 = vector.shape_cast %5 : vector<1x8x512xf32> to vector<8x512xf32>
    %c0_7 = arith.constant 0 : index
    %c0_8 = arith.constant 0 : index
    %7 = vector.load %arg2[%c0_7, %c0_8] : memref<128x512xf32, #tpu.memory_space<vmem>>, vector<128x512xf32>
    %cst = arith.constant dense<0.000000e+00> : vector<8x512xf32>
    %8 = tpu.matmul %3, %7, %cst {dimension_numbers = #tpu.dot_dimension_numbers<[1], [0], [0], [1], [0, 0, 1, 1], [], []>} : vector<8x128xf32>, vector<128x512xf32>, vector<8x512xf32> -> vector<8x512xf32>
    %9 = arith.addf %6, %8 : vector<8x512xf32>
    %10 = math.tanh %9 : vector<8x512xf32>
    %11 = vector.extract_strided_slice %10 {offsets = [0, 0], sizes = [8, 128], strides = [1, 1]} : vector<8x512xf32> to vector<8x128xf32>
    %cst_9 = arith.constant 5.000000e-01 : f32
    %12 = vector.broadcast %cst_9 : f32 to vector<8x128xf32>
    %13 = arith.mulf %12, %11 : vector<8x128xf32>
    %cst_10 = arith.constant 5.000000e-01 : f32
    %14 = vector.broadcast %cst_10 : f32 to vector<8x128xf32>
    %15 = arith.addf %13, %14 : vector<8x128xf32>
    %16 = vector.extract_strided_slice %10 {offsets = [0, 128], sizes = [8, 128], strides = [1, 1]} : vector<8x512xf32> to vector<8x128xf32>
    %cst_11 = arith.constant 5.000000e-01 : f32
    %17 = vector.broadcast %cst_11 : f32 to vector<8x128xf32>
    %18 = arith.mulf %17, %16 : vector<8x128xf32>
    %cst_12 = arith.constant 5.000000e-01 : f32
    %19 = vector.broadcast %cst_12 : f32 to vector<8x128xf32>
    %20 = arith.addf %18, %19 : vector<8x128xf32>
    %21 = vector.extract_strided_slice %10 {offsets = [0, 256], sizes = [8, 128], strides = [1, 1]} : vector<8x512xf32> to vector<8x128xf32>
    %22 = vector.extract_strided_slice %10 {offsets = [0, 384], sizes = [8, 128], strides = [1, 1]} : vector<8x512xf32> to vector<8x128xf32>
    %cst_13 = arith.constant 5.000000e-01 : f32
    %23 = vector.broadcast %cst_13 : f32 to vector<8x128xf32>
    %24 = arith.mulf %23, %22 : vector<8x128xf32>
    %cst_14 = arith.constant 5.000000e-01 : f32
    %25 = vector.broadcast %cst_14 : f32 to vector<8x128xf32>
    %26 = arith.addf %24, %25 : vector<8x128xf32>
    %27 = arith.mulf %20, %4 : vector<8x128xf32>
    %28 = arith.mulf %15, %21 : vector<8x128xf32>
    %29 = arith.addf %27, %28 : vector<8x128xf32>
    %30 = math.tanh %29 : vector<8x128xf32>
    %31 = arith.mulf %26, %30 : vector<8x128xf32>
    %c0_15 = arith.constant 0 : index
    %c0_16 = arith.constant 0 : index
    %c0_17 = arith.constant 0 : index
    %32 = vector.load %arg3[%c0_15, %c0_16, %c0_17] : memref<8x8x128xf32, #tpu.memory_space<vmem>>, vector<1x8x128xf32>
    %33 = vector.shape_cast %32 : vector<1x8x128xf32> to vector<8x128xf32>
    %34 = vector.shape_cast %31 : vector<8x128xf32> to vector<1x8x128xf32>
    tpu.vector_store %arg3[%c0_15, %c0_16, %c0_17], %34 {strides = array<i32>} : memref<8x8x128xf32, #tpu.memory_space<vmem>>, vector<1x8x128xf32>,
    %c1 = arith.constant 1 : index
    %c0_18 = arith.constant 0 : index
    %c0_19 = arith.constant 0 : index
    %35 = vector.load %arg1[%c1, %c0_18, %c0_19] : memref<8x8x512xf32, #tpu.memory_space<vmem>>, vector<1x8x512xf32>
    %36 = vector.shape_cast %35 : vector<1x8x512xf32> to vector<8x512xf32>
    %c0_20 = arith.constant 0 : index
    %c0_21 = arith.constant 0 : index
    %37 = vector.load %arg2[%c0_20, %c0_21] : memref<128x512xf32, #tpu.memory_space<vmem>>, vector<128x512xf32>
    %cst_22 = arith.constant dense<0.000000e+00> : vector<8x512xf32>
    %38 = tpu.matmul %31, %37, %cst_22 {dimension_numbers = #tpu.dot_dimension_numbers<[1], [0], [0], [1], [0, 0, 1, 1], [], []>} : vector<8x128xf32>, vector<128x512xf32>, vector<8x512xf32> -> vector<8x512xf32>
    %39 = arith.addf %36, %38 : vector<8x512xf32>
    %40 = math.tanh %39 : vector<8x512xf32>
    %41 = vector.extract_strided_slice %40 {offsets = [0, 0], sizes = [8, 128], strides = [1, 1]} : vector<8x512xf32> to vector<8x128xf32>
    %cst_23 = arith.constant 5.000000e-01 : f32
    %42 = vector.broadcast %cst_23 : f32 to vector<8x128xf32>
    %43 = arith.mulf %42, %41 : vector<8x128xf32>
    %cst_24 = arith.constant 5.000000e-01 : f32
    %44 = vector.broadcast %cst_24 : f32 to vector<8x128xf32>
    %45 = arith.addf %43, %44 : vector<8x128xf32>
    %46 = vector.extract_strided_slice %40 {offsets = [0, 128], sizes = [8, 128], strides = [1, 1]} : vector<8x512xf32> to vector<8x128xf32>
    %cst_25 = arith.constant 5.000000e-01 : f32
    %47 = vector.broadcast %cst_25 : f32 to vector<8x128xf32>
    %48 = arith.mulf %47, %46 : vector<8x128xf32>
    %cst_26 = arith.constant 5.000000e-01 : f32
    %49 = vector.broadcast %cst_26 : f32 to vector<8x128xf32>
    %50 = arith.addf %48, %49 : vector<8x128xf32>
    %51 = vector.extract_strided_slice %40 {offsets = [0, 256], sizes = [8, 128], strides = [1, 1]} : vector<8x512xf32> to vector<8x128xf32>
    %52 = vector.extract_strided_slice %40 {offsets = [0, 384], sizes = [8, 128], strides = [1, 1]} : vector<8x512xf32> to vector<8x128xf32>
    %cst_27 = arith.constant 5.000000e-01 : f32
    %53 = vector.broadcast %cst_27 : f32 to vector<8x128xf32>
    %54 = arith.mulf %53, %52 : vector<8x128xf32>
    %cst_28 = arith.constant 5.000000e-01 : f32
    %55 = vector.broadcast %cst_28 : f32 to vector<8x128xf32>
    %56 = arith.addf %54, %55 : vector<8x128xf32>
    %57 = arith.mulf %50, %29 : vector<8x128xf32>
    %58 = arith.mulf %45, %51 : vector<8x128xf32>
    %59 = arith.addf %57, %58 : vector<8x128xf32>
    %60 = math.tanh %59 : vector<8x128xf32>
    %61 = arith.mulf %56, %60 : vector<8x128xf32>
    %c1_29 = arith.constant 1 : index
    %c0_30 = arith.constant 0 : index
    %c0_31 = arith.constant 0 : index
    %62 = vector.load %arg3[%c1_29, %c0_30, %c0_31] : memref<8x8x128xf32, #tpu.memory_space<vmem>>, vector<1x8x128xf32>
    %63 = vector.shape_cast %62 : vector<1x8x128xf32> to vector<8x128xf32>
    %64 = vector.shape_cast %61 : vector<8x128xf32> to vector<1x8x128xf32>
    tpu.vector_store %arg3[%c1_29, %c0_30, %c0_31], %64 {strides = array<i32>} : memref<8x8x128xf32, #tpu.memory_space<vmem>>, vector<1x8x128xf32>,
    %c2 = arith.constant 2 : index
    %c0_32 = arith.constant 0 : index
    %c0_33 = arith.constant 0 : index
    %65 = vector.load %arg1[%c2, %c0_32, %c0_33] : memref<8x8x512xf32, #tpu.memory_space<vmem>>, vector<1x8x512xf32>
    %66 = vector.shape_cast %65 : vector<1x8x512xf32> to vector<8x512xf32>
    %c0_34 = arith.constant 0 : index
    %c0_35 = arith.constant 0 : index
    %67 = vector.load %arg2[%c0_34, %c0_35] : memref<128x512xf32, #tpu.memory_space<vmem>>, vector<128x512xf32>
    %cst_36 = arith.constant dense<0.000000e+00> : vector<8x512xf32>
    %68 = tpu.matmul %61, %67, %cst_36 {dimension_numbers = #tpu.dot_dimension_numbers<[1], [0], [0], [1], [0, 0, 1, 1], [], []>} : vector<8x128xf32>, vector<128x512xf32>, vector<8x512xf32> -> vector<8x512xf32>
    %69 = arith.addf %66, %68 : vector<8x512xf32>
    %70 = math.tanh %69 : vector<8x512xf32>
    %71 = vector.extract_strided_slice %70 {offsets = [0, 0], sizes = [8, 128], strides = [1, 1]} : vector<8x512xf32> to vector<8x128xf32>
    %cst_37 = arith.constant 5.000000e-01 : f32
    %72 = vector.broadcast %cst_37 : f32 to vector<8x128xf32>
    %73 = arith.mulf %72, %71 : vector<8x128xf32>
    %cst_38 = arith.constant 5.000000e-01 : f32
    %74 = vector.broadcast %cst_38 : f32 to vector<8x128xf32>
    %75 = arith.addf %73, %74 : vector<8x128xf32>
    %76 = vector.extract_strided_slice %70 {offsets = [0, 128], sizes = [8, 128], strides = [1, 1]} : vector<8x512xf32> to vector<8x128xf32>
    %cst_39 = arith.constant 5.000000e-01 : f32
    %77 = vector.broadcast %cst_39 : f32 to vector<8x128xf32>
    %78 = arith.mulf %77, %76 : vector<8x128xf32>
    %cst_40 = arith.constant 5.000000e-01 : f32
    %79 = vector.broadcast %cst_40 : f32 to vector<8x128xf32>
    %80 = arith.addf %78, %79 : vector<8x128xf32>
    %81 = vector.extract_strided_slice %70 {offsets = [0, 256], sizes = [8, 128], strides = [1, 1]} : vector<8x512xf32> to vector<8x128xf32>
    %82 = vector.extract_strided_slice %70 {offsets = [0, 384], sizes = [8, 128], strides = [1, 1]} : vector<8x512xf32> to vector<8x128xf32>
    %cst_41 = arith.constant 5.000000e-01 : f32
    %83 = vector.broadcast %cst_41 : f32 to vector<8x128xf32>
    %84 = arith.mulf %83, %82 : vector<8x128xf32>
    %cst_42 = arith.constant 5.000000e-01 : f32
    %85 = vector.broadcast %cst_42 : f32 to vector<8x128xf32>
    %86 = arith.addf %84, %85 : vector<8x128xf32>
    %87 = arith.mulf %80, %59 : vector<8x128xf32>
    %88 = arith.mulf %75, %81 : vector<8x128xf32>
    %89 = arith.addf %87, %88 : vector<8x128xf32>
    %90 = math.tanh %89 : vector<8x128xf32>
    %91 = arith.mulf %86, %90 : vector<8x128xf32>
    %c2_43 = arith.constant 2 : index
    %c0_44 = arith.constant 0 : index
    %c0_45 = arith.constant 0 : index
    %92 = vector.load %arg3[%c2_43, %c0_44, %c0_45] : memref<8x8x128xf32, #tpu.memory_space<vmem>>, vector<1x8x128xf32>
    %93 = vector.shape_cast %92 : vector<1x8x128xf32> to vector<8x128xf32>
    %94 = vector.shape_cast %91 : vector<8x128xf32> to vector<1x8x128xf32>
    tpu.vector_store %arg3[%c2_43, %c0_44, %c0_45], %94 {strides = array<i32>} : memref<8x8x128xf32, #tpu.memory_space<vmem>>, vector<1x8x128xf32>,
    %c3 = arith.constant 3 : index
    %c0_46 = arith.constant 0 : index
    %c0_47 = arith.constant 0 : index
    %95 = vector.load %arg1[%c3, %c0_46, %c0_47] : memref<8x8x512xf32, #tpu.memory_space<vmem>>, vector<1x8x512xf32>
    %96 = vector.shape_cast %95 : vector<1x8x512xf32> to vector<8x512xf32>
    %c0_48 = arith.constant 0 : index
    %c0_49 = arith.constant 0 : index
    %97 = vector.load %arg2[%c0_48, %c0_49] : memref<128x512xf32, #tpu.memory_space<vmem>>, vector<128x512xf32>
    %cst_50 = arith.constant dense<0.000000e+00> : vector<8x512xf32>
    %98 = tpu.matmul %91, %97, %cst_50 {dimension_numbers = #tpu.dot_dimension_numbers<[1], [0], [0], [1], [0, 0, 1, 1], [], []>} : vector<8x128xf32>, vector<128x512xf32>, vector<8x512xf32> -> vector<8x512xf32>
    %99 = arith.addf %96, %98 : vector<8x512xf32>
    %100 = math.tanh %99 : vector<8x512xf32>
    %101 = vector.extract_strided_slice %100 {offsets = [0, 0], sizes = [8, 128], strides = [1, 1]} : vector<8x512xf32> to vector<8x128xf32>
    %cst_51 = arith.constant 5.000000e-01 : f32
    %102 = vector.broadcast %cst_51 : f32 to vector<8x128xf32>
    %103 = arith.mulf %102, %101 : vector<8x128xf32>
    %cst_52 = arith.constant 5.000000e-01 : f32
    %104 = vector.broadcast %cst_52 : f32 to vector<8x128xf32>
    %105 = arith.addf %103, %104 : vector<8x128xf32>
    %106 = vector.extract_strided_slice %100 {offsets = [0, 128], sizes = [8, 128], strides = [1, 1]} : vector<8x512xf32> to vector<8x128xf32>
    %cst_53 = arith.constant 5.000000e-01 : f32
    %107 = vector.broadcast %cst_53 : f32 to vector<8x128xf32>
    %108 = arith.mulf %107, %106 : vector<8x128xf32>
    %cst_54 = arith.constant 5.000000e-01 : f32
    %109 = vector.broadcast %cst_54 : f32 to vector<8x128xf32>
    %110 = arith.addf %108, %109 : vector<8x128xf32>
    %111 = vector.extract_strided_slice %100 {offsets = [0, 256], sizes = [8, 128], strides = [1, 1]} : vector<8x512xf32> to vector<8x128xf32>
    %112 = vector.extract_strided_slice %100 {offsets = [0, 384], sizes = [8, 128], strides = [1, 1]} : vector<8x512xf32> to vector<8x128xf32>
    %cst_55 = arith.constant 5.000000e-01 : f32
    %113 = vector.broadcast %cst_55 : f32 to vector<8x128xf32>
    %114 = arith.mulf %113, %112 : vector<8x128xf32>
    %cst_56 = arith.constant 5.000000e-01 : f32
    %115 = vector.broadcast %cst_56 : f32 to vector<8x128xf32>
    %116 = arith.addf %114, %115 : vector<8x128xf32>
    %117 = arith.mulf %110, %89 : vector<8x128xf32>
    %118 = arith.mulf %105, %111 : vector<8x128xf32>
    %119 = arith.addf %117, %118 : vector<8x128xf32>
    %120 = math.tanh %119 : vector<8x128xf32>
    %121 = arith.mulf %116, %120 : vector<8x128xf32>
    %c3_57 = arith.constant 3 : index
    %c0_58 = arith.constant 0 : index
    %c0_59 = arith.constant 0 : index
    %122 = vector.load %arg3[%c3_57, %c0_58, %c0_59] : memref<8x8x128xf32, #tpu.memory_space<vmem>>, vector<1x8x128xf32>
    %123 = vector.shape_cast %122 : vector<1x8x128xf32> to vector<8x128xf32>
    %124 = vector.shape_cast %121 : vector<8x128xf32> to vector<1x8x128xf32>
    tpu.vector_store %arg3[%c3_57, %c0_58, %c0_59], %124 {strides = array<i32>} : memref<8x8x128xf32, #tpu.memory_space<vmem>>, vector<1x8x128xf32>,
    %c4 = arith.constant 4 : index
    %c0_60 = arith.constant 0 : index
    %c0_61 = arith.constant 0 : index
    %125 = vector.load %arg1[%c4, %c0_60, %c0_61] : memref<8x8x512xf32, #tpu.memory_space<vmem>>, vector<1x8x512xf32>
    %126 = vector.shape_cast %125 : vector<1x8x512xf32> to vector<8x512xf32>
    %c0_62 = arith.constant 0 : index
    %c0_63 = arith.constant 0 : index
    %127 = vector.load %arg2[%c0_62, %c0_63] : memref<128x512xf32, #tpu.memory_space<vmem>>, vector<128x512xf32>
    %cst_64 = arith.constant dense<0.000000e+00> : vector<8x512xf32>
    %128 = tpu.matmul %121, %127, %cst_64 {dimension_numbers = #tpu.dot_dimension_numbers<[1], [0], [0], [1], [0, 0, 1, 1], [], []>} : vector<8x128xf32>, vector<128x512xf32>, vector<8x512xf32> -> vector<8x512xf32>
    %129 = arith.addf %126, %128 : vector<8x512xf32>
    %130 = math.tanh %129 : vector<8x512xf32>
    %131 = vector.extract_strided_slice %130 {offsets = [0, 0], sizes = [8, 128], strides = [1, 1]} : vector<8x512xf32> to vector<8x128xf32>
    %cst_65 = arith.constant 5.000000e-01 : f32
    %132 = vector.broadcast %cst_65 : f32 to vector<8x128xf32>
    %133 = arith.mulf %132, %131 : vector<8x128xf32>
    %cst_66 = arith.constant 5.000000e-01 : f32
    %134 = vector.broadcast %cst_66 : f32 to vector<8x128xf32>
    %135 = arith.addf %133, %134 : vector<8x128xf32>
    %136 = vector.extract_strided_slice %130 {offsets = [0, 128], sizes = [8, 128], strides = [1, 1]} : vector<8x512xf32> to vector<8x128xf32>
    %cst_67 = arith.constant 5.000000e-01 : f32
    %137 = vector.broadcast %cst_67 : f32 to vector<8x128xf32>
    %138 = arith.mulf %137, %136 : vector<8x128xf32>
    %cst_68 = arith.constant 5.000000e-01 : f32
    %139 = vector.broadcast %cst_68 : f32 to vector<8x128xf32>
    %140 = arith.addf %138, %139 : vector<8x128xf32>
    %141 = vector.extract_strided_slice %130 {offsets = [0, 256], sizes = [8, 128], strides = [1, 1]} : vector<8x512xf32> to vector<8x128xf32>
    %142 = vector.extract_strided_slice %130 {offsets = [0, 384], sizes = [8, 128], strides = [1, 1]} : vector<8x512xf32> to vector<8x128xf32>
    %cst_69 = arith.constant 5.000000e-01 : f32
    %143 = vector.broadcast %cst_69 : f32 to vector<8x128xf32>
    %144 = arith.mulf %143, %142 : vector<8x128xf32>
    %cst_70 = arith.constant 5.000000e-01 : f32
    %145 = vector.broadcast %cst_70 : f32 to vector<8x128xf32>
    %146 = arith.addf %144, %145 : vector<8x128xf32>
    %147 = arith.mulf %140, %119 : vector<8x128xf32>
    %148 = arith.mulf %135, %141 : vector<8x128xf32>
    %149 = arith.addf %147, %148 : vector<8x128xf32>
    %150 = math.tanh %149 : vector<8x128xf32>
    %151 = arith.mulf %146, %150 : vector<8x128xf32>
    %c4_71 = arith.constant 4 : index
    %c0_72 = arith.constant 0 : index
    %c0_73 = arith.constant 0 : index
    %152 = vector.load %arg3[%c4_71, %c0_72, %c0_73] : memref<8x8x128xf32, #tpu.memory_space<vmem>>, vector<1x8x128xf32>
    %153 = vector.shape_cast %152 : vector<1x8x128xf32> to vector<8x128xf32>
    %154 = vector.shape_cast %151 : vector<8x128xf32> to vector<1x8x128xf32>
    tpu.vector_store %arg3[%c4_71, %c0_72, %c0_73], %154 {strides = array<i32>} : memref<8x8x128xf32, #tpu.memory_space<vmem>>, vector<1x8x128xf32>,
    %c5 = arith.constant 5 : index
    %c0_74 = arith.constant 0 : index
    %c0_75 = arith.constant 0 : index
    %155 = vector.load %arg1[%c5, %c0_74, %c0_75] : memref<8x8x512xf32, #tpu.memory_space<vmem>>, vector<1x8x512xf32>
    %156 = vector.shape_cast %155 : vector<1x8x512xf32> to vector<8x512xf32>
    %c0_76 = arith.constant 0 : index
    %c0_77 = arith.constant 0 : index
    %157 = vector.load %arg2[%c0_76, %c0_77] : memref<128x512xf32, #tpu.memory_space<vmem>>, vector<128x512xf32>
    %cst_78 = arith.constant dense<0.000000e+00> : vector<8x512xf32>
    %158 = tpu.matmul %151, %157, %cst_78 {dimension_numbers = #tpu.dot_dimension_numbers<[1], [0], [0], [1], [0, 0, 1, 1], [], []>} : vector<8x128xf32>, vector<128x512xf32>, vector<8x512xf32> -> vector<8x512xf32>
    %159 = arith.addf %156, %158 : vector<8x512xf32>
    %160 = math.tanh %159 : vector<8x512xf32>
    %161 = vector.extract_strided_slice %160 {offsets = [0, 0], sizes = [8, 128], strides = [1, 1]} : vector<8x512xf32> to vector<8x128xf32>
    %cst_79 = arith.constant 5.000000e-01 : f32
    %162 = vector.broadcast %cst_79 : f32 to vector<8x128xf32>
    %163 = arith.mulf %162, %161 : vector<8x128xf32>
    %cst_80 = arith.constant 5.000000e-01 : f32
    %164 = vector.broadcast %cst_80 : f32 to vector<8x128xf32>
    %165 = arith.addf %163, %164 : vector<8x128xf32>
    %166 = vector.extract_strided_slice %160 {offsets = [0, 128], sizes = [8, 128], strides = [1, 1]} : vector<8x512xf32> to vector<8x128xf32>
    %cst_81 = arith.constant 5.000000e-01 : f32
    %167 = vector.broadcast %cst_81 : f32 to vector<8x128xf32>
    %168 = arith.mulf %167, %166 : vector<8x128xf32>
    %cst_82 = arith.constant 5.000000e-01 : f32
    %169 = vector.broadcast %cst_82 : f32 to vector<8x128xf32>
    %170 = arith.addf %168, %169 : vector<8x128xf32>
    %171 = vector.extract_strided_slice %160 {offsets = [0, 256], sizes = [8, 128], strides = [1, 1]} : vector<8x512xf32> to vector<8x128xf32>
    %172 = vector.extract_strided_slice %160 {offsets = [0, 384], sizes = [8, 128], strides = [1, 1]} : vector<8x512xf32> to vector<8x128xf32>
    %cst_83 = arith.constant 5.000000e-01 : f32
    %173 = vector.broadcast %cst_83 : f32 to vector<8x128xf32>
    %174 = arith.mulf %173, %172 : vector<8x128xf32>
    %cst_84 = arith.constant 5.000000e-01 : f32
    %175 = vector.broadcast %cst_84 : f32 to vector<8x128xf32>
    %176 = arith.addf %174, %175 : vector<8x128xf32>
    %177 = arith.mulf %170, %149 : vector<8x128xf32>
    %178 = arith.mulf %165, %171 : vector<8x128xf32>
    %179 = arith.addf %177, %178 : vector<8x128xf32>
    %180 = math.tanh %179 : vector<8x128xf32>
    %181 = arith.mulf %176, %180 : vector<8x128xf32>
    %c5_85 = arith.constant 5 : index
    %c0_86 = arith.constant 0 : index
    %c0_87 = arith.constant 0 : index
    %182 = vector.load %arg3[%c5_85, %c0_86, %c0_87] : memref<8x8x128xf32, #tpu.memory_space<vmem>>, vector<1x8x128xf32>
    %183 = vector.shape_cast %182 : vector<1x8x128xf32> to vector<8x128xf32>
    %184 = vector.shape_cast %181 : vector<8x128xf32> to vector<1x8x128xf32>
    tpu.vector_store %arg3[%c5_85, %c0_86, %c0_87], %184 {strides = array<i32>} : memref<8x8x128xf32, #tpu.memory_space<vmem>>, vector<1x8x128xf32>,
    %c6 = arith.constant 6 : index
    %c0_88 = arith.constant 0 : index
    %c0_89 = arith.constant 0 : index
    %185 = vector.load %arg1[%c6, %c0_88, %c0_89] : memref<8x8x512xf32, #tpu.memory_space<vmem>>, vector<1x8x512xf32>
    %186 = vector.shape_cast %185 : vector<1x8x512xf32> to vector<8x512xf32>
    %c0_90 = arith.constant 0 : index
    %c0_91 = arith.constant 0 : index
    %187 = vector.load %arg2[%c0_90, %c0_91] : memref<128x512xf32, #tpu.memory_space<vmem>>, vector<128x512xf32>
    %cst_92 = arith.constant dense<0.000000e+00> : vector<8x512xf32>
    %188 = tpu.matmul %181, %187, %cst_92 {dimension_numbers = #tpu.dot_dimension_numbers<[1], [0], [0], [1], [0, 0, 1, 1], [], []>} : vector<8x128xf32>, vector<128x512xf32>, vector<8x512xf32> -> vector<8x512xf32>
    %189 = arith.addf %186, %188 : vector<8x512xf32>
    %190 = math.tanh %189 : vector<8x512xf32>
    %191 = vector.extract_strided_slice %190 {offsets = [0, 0], sizes = [8, 128], strides = [1, 1]} : vector<8x512xf32> to vector<8x128xf32>
    %cst_93 = arith.constant 5.000000e-01 : f32
    %192 = vector.broadcast %cst_93 : f32 to vector<8x128xf32>
    %193 = arith.mulf %192, %191 : vector<8x128xf32>
    %cst_94 = arith.constant 5.000000e-01 : f32
    %194 = vector.broadcast %cst_94 : f32 to vector<8x128xf32>
    %195 = arith.addf %193, %194 : vector<8x128xf32>
    %196 = vector.extract_strided_slice %190 {offsets = [0, 128], sizes = [8, 128], strides = [1, 1]} : vector<8x512xf32> to vector<8x128xf32>
    %cst_95 = arith.constant 5.000000e-01 : f32
    %197 = vector.broadcast %cst_95 : f32 to vector<8x128xf32>
    %198 = arith.mulf %197, %196 : vector<8x128xf32>
    %cst_96 = arith.constant 5.000000e-01 : f32
    %199 = vector.broadcast %cst_96 : f32 to vector<8x128xf32>
    %200 = arith.addf %198, %199 : vector<8x128xf32>
    %201 = vector.extract_strided_slice %190 {offsets = [0, 256], sizes = [8, 128], strides = [1, 1]} : vector<8x512xf32> to vector<8x128xf32>
    %202 = vector.extract_strided_slice %190 {offsets = [0, 384], sizes = [8, 128], strides = [1, 1]} : vector<8x512xf32> to vector<8x128xf32>
    %cst_97 = arith.constant 5.000000e-01 : f32
    %203 = vector.broadcast %cst_97 : f32 to vector<8x128xf32>
    %204 = arith.mulf %203, %202 : vector<8x128xf32>
    %cst_98 = arith.constant 5.000000e-01 : f32
    %205 = vector.broadcast %cst_98 : f32 to vector<8x128xf32>
    %206 = arith.addf %204, %205 : vector<8x128xf32>
    %207 = arith.mulf %200, %179 : vector<8x128xf32>
    %208 = arith.mulf %195, %201 : vector<8x128xf32>
    %209 = arith.addf %207, %208 : vector<8x128xf32>
    %210 = math.tanh %209 : vector<8x128xf32>
    %211 = arith.mulf %206, %210 : vector<8x128xf32>
    %c6_99 = arith.constant 6 : index
    %c0_100 = arith.constant 0 : index
    %c0_101 = arith.constant 0 : index
    %212 = vector.load %arg3[%c6_99, %c0_100, %c0_101] : memref<8x8x128xf32, #tpu.memory_space<vmem>>, vector<1x8x128xf32>
    %213 = vector.shape_cast %212 : vector<1x8x128xf32> to vector<8x128xf32>
    %214 = vector.shape_cast %211 : vector<8x128xf32> to vector<1x8x128xf32>
    tpu.vector_store %arg3[%c6_99, %c0_100, %c0_101], %214 {strides = array<i32>} : memref<8x8x128xf32, #tpu.memory_space<vmem>>, vector<1x8x128xf32>,
    %c7 = arith.constant 7 : index
    %c0_102 = arith.constant 0 : index
    %c0_103 = arith.constant 0 : index
    %215 = vector.load %arg1[%c7, %c0_102, %c0_103] : memref<8x8x512xf32, #tpu.memory_space<vmem>>, vector<1x8x512xf32>
    %216 = vector.shape_cast %215 : vector<1x8x512xf32> to vector<8x512xf32>
    %c0_104 = arith.constant 0 : index
    %c0_105 = arith.constant 0 : index
    %217 = vector.load %arg2[%c0_104, %c0_105] : memref<128x512xf32, #tpu.memory_space<vmem>>, vector<128x512xf32>
    %cst_106 = arith.constant dense<0.000000e+00> : vector<8x512xf32>
    %218 = tpu.matmul %211, %217, %cst_106 {dimension_numbers = #tpu.dot_dimension_numbers<[1], [0], [0], [1], [0, 0, 1, 1], [], []>} : vector<8x128xf32>, vector<128x512xf32>, vector<8x512xf32> -> vector<8x512xf32>
    %219 = arith.addf %216, %218 : vector<8x512xf32>
    %220 = math.tanh %219 : vector<8x512xf32>
    %221 = vector.extract_strided_slice %220 {offsets = [0, 0], sizes = [8, 128], strides = [1, 1]} : vector<8x512xf32> to vector<8x128xf32>
    %cst_107 = arith.constant 5.000000e-01 : f32
    %222 = vector.broadcast %cst_107 : f32 to vector<8x128xf32>
    %223 = arith.mulf %222, %221 : vector<8x128xf32>
    %cst_108 = arith.constant 5.000000e-01 : f32
    %224 = vector.broadcast %cst_108 : f32 to vector<8x128xf32>
    %225 = arith.addf %223, %224 : vector<8x128xf32>
    %226 = vector.extract_strided_slice %220 {offsets = [0, 128], sizes = [8, 128], strides = [1, 1]} : vector<8x512xf32> to vector<8x128xf32>
    %cst_109 = arith.constant 5.000000e-01 : f32
    %227 = vector.broadcast %cst_109 : f32 to vector<8x128xf32>
    %228 = arith.mulf %227, %226 : vector<8x128xf32>
    %cst_110 = arith.constant 5.000000e-01 : f32
    %229 = vector.broadcast %cst_110 : f32 to vector<8x128xf32>
    %230 = arith.addf %228, %229 : vector<8x128xf32>
    %231 = vector.extract_strided_slice %220 {offsets = [0, 256], sizes = [8, 128], strides = [1, 1]} : vector<8x512xf32> to vector<8x128xf32>
    %232 = vector.extract_strided_slice %220 {offsets = [0, 384], sizes = [8, 128], strides = [1, 1]} : vector<8x512xf32> to vector<8x128xf32>
    %cst_111 = arith.constant 5.000000e-01 : f32
    %233 = vector.broadcast %cst_111 : f32 to vector<8x128xf32>
    %234 = arith.mulf %233, %232 : vector<8x128xf32>
    %cst_112 = arith.constant 5.000000e-01 : f32
    %235 = vector.broadcast %cst_112 : f32 to vector<8x128xf32>
    %236 = arith.addf %234, %235 : vector<8x128xf32>
    %237 = arith.mulf %230, %209 : vector<8x128xf32>
    %238 = arith.mulf %225, %231 : vector<8x128xf32>
    %239 = arith.addf %237, %238 : vector<8x128xf32>
    %240 = math.tanh %239 : vector<8x128xf32>
    %241 = arith.mulf %236, %240 : vector<8x128xf32>
    %c7_113 = arith.constant 7 : index
    %c0_114 = arith.constant 0 : index
    %c0_115 = arith.constant 0 : index
    %242 = vector.load %arg3[%c7_113, %c0_114, %c0_115] : memref<8x8x128xf32, #tpu.memory_space<vmem>>, vector<1x8x128xf32>
    %243 = vector.shape_cast %242 : vector<1x8x128xf32> to vector<8x128xf32>
    %244 = vector.shape_cast %241 : vector<8x128xf32> to vector<1x8x128xf32>
    tpu.vector_store %arg3[%c7_113, %c0_114, %c0_115], %244 {strides = array<i32>} : memref<8x8x128xf32, #tpu.memory_space<vmem>>, vector<1x8x128xf32>,
    %c0_116 = arith.constant 0 : index
    %c0_117 = arith.constant 0 : index
    %245 = vector.load %arg5[%c0_116, %c0_117] : memref<8x128xf32, #tpu.memory_space<vmem>>, vector<8x128xf32>
    tpu.vector_store %arg5[%c0_116, %c0_117], %241 {strides = array<i32>} : memref<8x128xf32, #tpu.memory_space<vmem>>, vector<8x128xf32>,
    %c0_118 = arith.constant 0 : index
    %c0_119 = arith.constant 0 : index
    %246 = vector.load %arg6[%c0_118, %c0_119] : memref<8x128xf32, #tpu.memory_space<vmem>>, vector<8x128xf32>
    tpu.vector_store %arg6[%c0_118, %c0_119], %239 {strides = array<i32>} : memref<8x128xf32, #tpu.memory_space<vmem>>, vector<8x128xf32>,
    %c0_i32_120 = arith.constant 0 : i32
    %247 = arith.cmpi eq, %arg0, %c0_i32_120 : i32
    %248 = arith.extui %247 : i1 to i32
    %c0_i32_121 = arith.constant 0 : i32
    %249 = arith.cmpi ne, %248, %c0_i32_121 : i32
    scf.if %249 {
      %c0_122 = arith.constant 0 : index
      %c0_123 = arith.constant 0 : index
      %c0_124 = arith.constant 0 : index
      %250 = vector.load %arg4[%c0_122, %c0_123, %c0_124] : memref<1x8x128xf32, #tpu.memory_space<vmem>>, vector<1x8x128xf32>
      %251 = vector.shape_cast %250 : vector<1x8x128xf32> to vector<8x128xf32>
      %252 = vector.shape_cast %239 : vector<8x128xf32> to vector<1x8x128xf32>
      tpu.vector_store %arg4[%c0_122, %c0_123, %c0_124], %252 {strides = array<i32>} : memref<1x8x128xf32, #tpu.memory_space<vmem>>, vector<1x8x128xf32>,
    } else {
    }
    return
  }
  func.func @transform_0(%arg0: i32) -> (i32, i32, i32) {
    %c0_i32 = arith.constant 0 : i32
    %c0_i32_0 = arith.constant 0 : i32
    %c0_i32_1 = arith.constant 0 : i32
    return %arg0, %c0_i32, %c0_i32_0 : i32, i32, i32
  }
  func.func @transform_1(%arg0: i32) -> (i32, i32) {
    %c0_i32 = arith.constant 0 : i32
    %c0_i32_0 = arith.constant 0 : i32
    %c0_i32_1 = arith.constant 0 : i32
    return %c0_i32, %c0_i32_0 : i32, i32
  }
  func.func @transform_2(%arg0: i32) -> (i32, i32, i32) {
    %c0_i32 = arith.constant 0 : i32
    %c0_i32_0 = arith.constant 0 : i32
    %c0_i32_1 = arith.constant 0 : i32
    return %arg0, %c0_i32, %c0_i32_0 : i32, i32, i32
  }
  func.func @transform_3(%arg0: i32) -> (i32, i32, i32) {
    %c0_i32 = arith.constant 0 : i32
    %c0_i32_0 = arith.constant 0 : i32
    %c0_i32_1 = arith.constant 0 : i32
    %c0_i32_2 = arith.constant 0 : i32
    return %c0_i32, %c0_i32_0, %c0_i32_1 : i32, i32, i32
  }
}

</mosaic_0001>

<bundles_post_ra>
// kernel: dp_fast_lstm_forward.1
= control target key start
LH: loop header
LB: loop body
LE: loop exit
PB: predicated region body
PF: predicated region fallthrough
CT: control target
= control target key end

     0   :  { %v2517_v3 = vmov 0.0   ;;  %s3471_s1 = inlined_call_operand.vmem [shape: f32[128,512], index: 1, kind: input, shape index: {}]   ;;  %s3472_s0 = inlined_call_operand.vmem [shape: f32[8,8,512], index: 0, kind: input, shape index: {}]   ;;  %s3473_s2 = inlined_call_operand.vmem [shape: f32[8,8,128], index: 2, kind: output, shape index: {0}]   ;;  %s3474_s3 = inlined_call_operand.vmem [shape: f32[1,8,128], index: 3, kind: output, shape index: {1}]  }
   0x1   :  { %v26_v0 = vld [vmem:[%s3471_s1 + $0x8] sm:$0xff]  ;;  %v25_v2 = vld [vmem:[%s3471_s1] sm:$0xff]  ;;  %153 = vmatprep.mubr.f32.mxu0 %v2517_v3  ;;  %224 = vmatprep.mubr.f32.mxu1 %v2517_v3  ;;  %v28_v10 = vld [vmem:[%s3471_s1 + $0x18] sm:$0xff] }
   0x2   :  { %v30_v1 = vld [vmem:[%s3471_s1 + $0x28] sm:$0xff]  ;;  %v29_v5 = vld [vmem:[%s3471_s1 + $0x20] sm:$0xff]  ;;  %v32_v11 = vld [vmem:[%s3471_s1 + $0x38] sm:$0xff] }
   0x3   :  { %v2549_v4 = vpack.c.bf16 %v30_v1, %v26_v0  ;;  %v34_v6 = vld [vmem:[%s3471_s1 + $0x48] sm:$0xff]  ;;  %v2560_v8 = vpack.c.bf16 %v29_v5, %v25_v2  ;;  %v33_v12 = vld [vmem:[%s3471_s1 + $0x40] sm:$0xff]  ;;  %v2574_v13 = vpack.c.bf16 %v32_v11, %v28_v10  ;;  %v27_v15 = vld [vmem:[%s3471_s1 + $0x10] sm:$0xff] }
   0x4   :  { %v38_v7 = vld [vmem:[%s3471_s1 + $0x68] sm:$0xff]  ;;  %v37_v14 = vld [vmem:[%s3471_s1 + $0x60] sm:$0xff]  ;;  %v31_v16 = vld [vmem:[%s3471_s1 + $0x30] sm:$0xff] }
   0x5   :  { %v2562_v9 = vpack.c.bf16 %v38_v7, %v34_v6  ;;  %1925 = vmatprep.subr.bf16.mxu0 %v2549_v4  ;;  %v2586_v17 = vpack.c.bf16 %v37_v14, %v33_v12  ;;  %v2588_v18 = vpack.c.bf16 %v31_v16, %v27_v15  ;;  %v42_v19 = vld [vmem:[%s3471_s1 + $0x88] sm:$0xff]  ;;  %v36_v21 = vld [vmem:[%s3471_s1 + $0x58] sm:$0xff]  ;;  %1957 = vmatprep.subr.bf16.mxu1 %v2574_v13  ;;  %v41_v24 = vld [vmem:[%s3471_s1 + $0x80] sm:$0xff] }
   0x6   :  { %1927 = vmatpush1.bf16.msra.mxu0 %v2560_v8  ;;  %v46_v20 = vld [vmem:[%s3471_s1 + $0xa8] sm:$0xff]  ;;  %v40_v23 = vld [vmem:[%s3471_s1 + $0x78] sm:$0xff]  ;;  %v45_v25 = vld [vmem:[%s3471_s1 + $0xa0] sm:$0xff] }
   0x7   :  { %1929 = vmatprep.subr.bf16.mxu0 %v2562_v9  ;;  %v2601_v22 = vpack.c.bf16 %v46_v20, %v42_v19  ;;  %1959 = vmatpush1.bf16.msra.mxu1 %v2588_v18  ;;  %v2613_v26 = vpack.c.bf16 %v40_v23, %v36_v21  ;;  %v35_v27 = vld [vmem:[%s3471_s1 + $0x50] sm:$0xff]  ;;  %v50_v29 = vld [vmem:[%s3471_s1 + $0xc8] sm:$0xff]  ;;  %v44_v32 = vld [vmem:[%s3471_s1 + $0x98] sm:$0xff]  ;;  %v2637_v34 = vpack.c.bf16 %v45_v25, %v41_v24 }
   0x8   :  { %v39_v28 = vld [vmem:[%s3471_s1 + $0x70] sm:$0xff]  ;;  %v54_v31 = vld [vmem:[%s3471_s1 + $0xe8] sm:$0xff]  ;;  %v48_v33 = vld [vmem:[%s3471_s1 + $0xb8] sm:$0xff] }
   0x9   :  { %v2624_v30 = vpack.c.bf16 %v39_v28, %v35_v27  ;;  %1961 = vmatprep.subr.bf16.mxu1 %v2613_v26  ;;  %v2639_v35 = vpack.c.bf16 %v48_v33, %v44_v32  ;;  %v49_v36 = vld [vmem:[%s3471_s1 + $0xc0] sm:$0xff]  ;;  %v43_v37 = vld [vmem:[%s3471_s1 + $0x90] sm:$0xff]  ;;  %v2648_v38 = vpack.c.bf16 %v54_v31, %v50_v29  ;;  %v58_v41 = vld [vmem:[%s3471_s1 + $0x108] sm:$0xff] }
   0xa   :  { %1931 = vmatpush1.bf16.msra.mxu0 %v2586_v17  ;;  %v53_v39 = vld [vmem:[%s3471_s1 + $0xe0] sm:$0xff]  ;;  %v47_v40 = vld [vmem:[%s3471_s1 + $0xb0] sm:$0xff]  ;;  %v62_v43 = vld [vmem:[%s3471_s1 + $0x128] sm:$0xff] }
   0xb   :  { %1933 = vmatprep.subr.bf16.mxu0 %v2601_v22  ;;  %1963 = vmatpush1.bf16.msra.mxu1 %v2624_v30  ;;  %v2660_v42 = vpack.c.bf16 %v47_v40, %v43_v37  ;;  %v52_v44 = vld [vmem:[%s3471_s1 + $0xd8] sm:$0xff]  ;;  %v51_v47 = vld [vmem:[%s3471_s1 + $0xd0] sm:$0xff]  ;;  %v2681_v49 = vpack.c.bf16 %v53_v39, %v49_v36  ;;  %v2687_v51 = vpack.c.bf16 %v62_v43, %v58_v41  ;;  %v57_v52 = vld [vmem:[%s3471_s1 + $0x100] sm:$0xff] }
   0xc   :  { %v56_v45 = vld [vmem:[%s3471_s1 + $0xf8] sm:$0xff]  ;;  %1965 = vmatprep.subr.bf16.mxu1 %v2639_v35  ;;  %v55_v48 = vld [vmem:[%s3471_s1 + $0xf0] sm:$0xff]  ;;  %v61_v53 = vld [vmem:[%s3471_s1 + $0x120] sm:$0xff] }
   0xd   :  { %v2672_v46 = vpack.c.bf16 %v56_v45, %v52_v44  ;;  %v60_v50 = vld [vmem:[%s3471_s1 + $0x118] sm:$0xff]  ;;  %v2699_v55 = vpack.c.bf16 %v55_v48, %v51_v47  ;;  %v66_v56 = vld [vmem:[%s3471_s1 + $0x148] sm:$0xff]  ;;  %v59_v59 = vld [vmem:[%s3471_s1 + $0x110] sm:$0xff]  ;;  %v2717_v61 = vpack.c.bf16 %v61_v53, %v57_v52 }
   0xe   :  { %1935 = vmatpush1.bf16.msra.mxu0 %v2637_v34  ;;  %v64_v54 = vld [vmem:[%s3471_s1 + $0x138] sm:$0xff]  ;;  %v70_v57 = vld [vmem:[%s3471_s1 + $0x168] sm:$0xff]  ;;  %v63_v60 = vld [vmem:[%s3471_s1 + $0x130] sm:$0xff] }
   0xf   :  { %1937 = vmatprep.subr.bf16.mxu0 %v2648_v38  ;;  %1967 = vmatpush1.bf16.msra.mxu1 %v2660_v42  ;;  %v2708_v58 = vpack.c.bf16 %v64_v54, %v60_v50  ;;  %v68_v62 = vld [vmem:[%s3471_s1 + $0x158] sm:$0xff]  ;;  %v2726_v0 = vpack.c.bf16 %v70_v57, %v66_v56  ;;  %v65_v1 = vld [vmem:[%s3471_s1 + $0x140] sm:$0xff]  ;;  %v2735_v5 = vpack.c.bf16 %v63_v60, %v59_v59  ;;  %v74_v6 = vld [vmem:[%s3471_s1 + $0x188] sm:$0xff] }
  0x10   :  { %1969 = vmatprep.subr.bf16.mxu1 %v2672_v46  ;;  %v72_v63 = vld [vmem:[%s3471_s1 + $0x178] sm:$0xff]  ;;  %v69_v2 = vld [vmem:[%s3471_s1 + $0x160] sm:$0xff]  ;;  %v78_v7 = vld [vmem:[%s3471_s1 + $0x1a8] sm:$0xff] }
  0x11   :  { %v2744_v10 = vpack.c.bf16 %v72_v63, %v68_v62  ;;  %v67_v11 = vld [vmem:[%s3471_s1 + $0x150] sm:$0xff]  ;;  %v2753_v14 = vpack.c.bf16 %v69_v2, %v65_v1  ;;  %v76_v15 = vld [vmem:[%s3471_s1 + $0x198] sm:$0xff]  ;;  %v2762_v19 = vpack.c.bf16 %v78_v7, %v74_v6  ;;  %v73_v20 = vld [vmem:[%s3471_s1 + $0x180] sm:$0xff] }
  0x12   :  { %1939 = vmatpush1.bf16.msra.mxu0 %v2681_v49  ;;  %v71_v12 = vld [vmem:[%s3471_s1 + $0x170] sm:$0xff]  ;;  %v80_v16 = vld [vmem:[%s3471_s1 + $0x1b8] sm:$0xff]  ;;  %v77_v21 = vld [vmem:[%s3471_s1 + $0x1a0] sm:$0xff] }
  0x13   :  { %1941 = vmatprep.subr.bf16.mxu0 %v2687_v51  ;;  %1971 = vmatpush1.bf16.msra.mxu1 %v2699_v55  ;;  %v2771_v23 = vpack.c.bf16 %v71_v12, %v67_v11  ;;  %v82_v24 = vld [vmem:[%s3471_s1 + $0x1c8] sm:$0xff]  ;;  %v2780_v27 = vpack.c.bf16 %v80_v16, %v76_v15  ;;  %v75_v28 = vld [vmem:[%s3471_s1 + $0x190] sm:$0xff]  ;;  %v2789_v31 = vpack.c.bf16 %v77_v21, %v73_v20  ;;  %v84_v32 = vld [vmem:[%s3471_s1 + $0x1d8] sm:$0xff] }
  0x14   :  { %1973 = vmatprep.subr.bf16.mxu1 %v2708_v58  ;;  %v86_v25 = vld [vmem:[%s3471_s1 + $0x1e8] sm:$0xff]  ;;  %v79_v29 = vld [vmem:[%s3471_s1 + $0x1b0] sm:$0xff]  ;;  %v88_v33 = vld [vmem:[%s3471_s1 + $0x1f8] sm:$0xff] }
  0x15   :  { %v2798_v36 = vpack.c.bf16 %v86_v25, %v82_v24  ;;  %v81_v37 = vld [vmem:[%s3471_s1 + $0x1c0] sm:$0xff]  ;;  %v2807_v40 = vpack.c.bf16 %v79_v29, %v75_v28  ;;  %v2810_v41 = vpack.c.bf16 %v88_v33, %v84_v32  ;;  %v83_v43 = vld [vmem:[%s3471_s1 + $0x1d0] sm:$0xff]  ;;  %v22_v50 = vld [vmem:[%s3472_s0 + $0x8] sm:$0xff] }
  0x16   :  { %1943 = vmatpush1.bf16.msra.mxu0 %v2717_v61  ;;  %v85_v39 = vld [vmem:[%s3471_s1 + $0x1e0] sm:$0xff]  ;;  %v87_v44 = vld [vmem:[%s3471_s1 + $0x1f0] sm:$0xff]  ;;  %v24_v63 = vld [vmem:[%s3472_s0 + $0x18] sm:$0xff] }
  0x17   :  { %1945 = vmatprep.subr.bf16.mxu0 %v2726_v0  ;;  %1975 = vmatpush1.bf16.msra.mxu1 %v2735_v5  ;;  %v2819_v45 = vpack.c.bf16 %v85_v39, %v81_v37  ;;  %v2823_v47 = vpack.c.bf16 %v87_v44, %v83_v43  ;;  %v21_v48 = vld [vmem:[%s3472_s0] sm:$0xff]  ;;  %v23_v53 = vld [vmem:[%s3472_s0 + $0x10] sm:$0xff]  ;;  %v1890_v39 = vld [vmem:[%s3472_s0 + $0x28] sm:$0xff] }
  0x18   :  { %1977 = vmatprep.subr.bf16.mxu1 %v2744_v10  ;;  %v1889_v37 = vld [vmem:[%s3472_s0 + $0x20] sm:$0xff]  ;;  %v1891_v44 = vld [vmem:[%s3472_s0 + $0x30] sm:$0xff] }
  0x1a   :  { %1947 = vmatpush1.bf16.msra.mxu0 %v2753_v14 }
  0x1b   :  { %1949 = vmatprep.subr.bf16.mxu0 %v2762_v19  ;;  %1979 = vmatpush1.bf16.msra.mxu1 %v2771_v23 }
  0x1c   :  { %1981 = vmatprep.subr.bf16.mxu1 %v2780_v27 }
  0x1e   :  { %1951 = vmatpush1.bf16.msra.mxu0 %v2789_v31 }
  0x1f   :  { %1953 = vmatprep.subr.bf16.mxu0 %v2798_v36  ;;  %1983 = vmatpush1.bf16.msra.mxu1 %v2807_v40 }
  0x20   :  { %1985 = vmatprep.subr.bf16.mxu1 %v2810_v41 }
  0x22   :  { %1955 = vmatpush1.bf16.msra.mxu0 %v2819_v45 }
  0x23   :  { %1989 = vmatprep.subr.bf16.mxu0 %v2549_v4  ;;  %1987 = vmatpush1.bf16.msra.mxu1 %v2823_v47 }
  0x24   :  { %2021 = vmatprep.subr.bf16.mxu1 %v2574_v13 }
  0x25   :  { %154 = vmatmul.mubr.f32.vlgmr.msra.gmra.mrb[0].mxu0 %v2517_v3 }
  0x26   :  { %1991 = vmatpush1.bf16.msra.mxu0 %v2560_v8  ;;  %384 = vmatprep.mubr.f32.mxu0 %v2517_v3 }
  0x27   :  { %225 = vmatmul.mubr.f32.vlgmr.msra.gmra.mrb[0].mxu1 %v2517_v3  ;;  %1993 = vmatprep.subr.bf16.mxu0 %v2562_v9 }
  0x28   :  { %2023 = vmatpush1.bf16.msra.mxu1 %v2588_v18  ;;  %455 = vmatprep.mubr.f32.mxu1 %v2517_v3 }
  0x29   :  { %2025 = vmatprep.subr.bf16.mxu1 %v2613_v26 }
  0x2a   :  { %1995 = vmatpush1.bf16.msra.mxu0 %v2586_v17 }
  0x2b   :  { %1997 = vmatprep.subr.bf16.mxu0 %v2601_v22 }
  0x2c   :  { %2027 = vmatpush1.bf16.msra.mxu1 %v2624_v30 }
  0x2d   :  { %2029 = vmatprep.subr.bf16.mxu1 %v2639_v35 }
  0x2e   :  { %1999 = vmatpush1.bf16.msra.mxu0 %v2637_v34 }
  0x2f   :  { %2001 = vmatprep.subr.bf16.mxu0 %v2648_v38 }
  0x30   :  { %2031 = vmatpush1.bf16.msra.mxu1 %v2660_v42 }
  0x31   :  { %2033 = vmatprep.subr.bf16.mxu1 %v2672_v46 }
  0x32   :  { %2003 = vmatpush1.bf16.msra.mxu0 %v2681_v49 }
  0x33   :  { %2005 = vmatprep.subr.bf16.mxu0 %v2687_v51 }
  0x34   :  { %2035 = vmatpush1.bf16.msra.mxu1 %v2699_v55 }
  0x35   :  { %2037 = vmatprep.subr.bf16.mxu1 %v2708_v58 }
  0x36   :  { %2007 = vmatpush1.bf16.msra.mxu0 %v2717_v61 }
  0x37   :  { %2009 = vmatprep.subr.bf16.mxu0 %v2726_v0 }
  0x38   :  { %2039 = vmatpush1.bf16.msra.mxu1 %v2735_v5 }
  0x39   :  { %2041 = vmatprep.subr.bf16.mxu1 %v2744_v10 }
  0x3a   :  { %2011 = vmatpush1.bf16.msra.mxu0 %v2753_v14 }
  0x3b   :  { %2013 = vmatprep.subr.bf16.mxu0 %v2762_v19 }
  0x3c   :  { %2043 = vmatpush1.bf16.msra.mxu1 %v2771_v23 }
  0x3d   :  { %2045 = vmatprep.subr.bf16.mxu1 %v2780_v27 }
  0x3e   :  { %2015 = vmatpush1.bf16.msra.mxu0 %v2789_v31 }
  0x3f   :  { %2017 = vmatprep.subr.bf16.mxu0 %v2798_v36 }
  0x40   :  { %2047 = vmatpush1.bf16.msra.mxu1 %v2807_v40 }
  0x41   :  { %2049 = vmatprep.subr.bf16.mxu1 %v2810_v41 }
  0x42   :  { %2019 = vmatpush1.bf16.msra.mxu0 %v2819_v45 }
  0x43   :  { %2053 = vmatprep.subr.bf16.mxu0 %v2549_v4 }
  0x44   :  { %2051 = vmatpush1.bf16.msra.mxu1 %v2823_v47 }
  0x45   :  { %2085 = vmatprep.subr.bf16.mxu1 %v2574_v13 }
  0xf8   :  { %v155_v52 = vpop.f32.mrb[0].mxu0 }
  0xf9   :  { %v231_v54 = vadd.f32 %v155_v52, %v21_v48  ;;  %v157_v56 = vpop.f32.mrb[1].mxu0 }
  0xfa   :  { %v232_v57 = vadd.f32 %v157_v56, %v22_v50  ;;  %v226_v59 = vpop.f32.mrb[0].mxu1 }
  0xfb   :  { %2437 = vtanh.f32 %v231_v54  ;;  %v233_v60 = vadd.f32 %v226_v59, %v23_v53  ;;  %v228_v62 = vpop.f32.mrb[1].mxu1  ;;  %v1892_v54 = vld [vmem:[%s3472_s0 + $0x38] sm:$0xff] }
  0xfc   :  { %2439 = vtanh.f32 %v232_v57  ;;  %v234_v1 = vadd.f32 %v228_v62, %v24_v63 }
  0xfd   :  { %2441 = vtanh.f32 %v233_v60 }
  0xfe   :  { %2443 = vtanh.f32 %v234_v1 }
 0x105   :  { %v2438_v2 = vpop.eup %2437 }
 0x106   :  { %v2440_v6 = vpop.eup %2439  ;;  %v239_v7 = vmul.f32 0.5, %v2438_v2 }
 0x107   :  { %v2442_v11 = vpop.eup %2441  ;;  %v241_v12 = vmul.f32 0.5, %v2440_v6 }
 0x108   :  { %v240_v15 = vadd.f32 0.5, %v239_v7  ;;  %v2444_v25 = vpop.eup %2443 }
 0x109   :  { %v242_v16 = vadd.f32 0.5, %v241_v12  ;;  %v243_v28 = vmul.f32 0.5, %v2444_v25  ;;  %v959_v25 = vld [vmem:[%s3471_s1 + $0x38] sm:$0xff] }
 0x10a   :  { %v246_v20 = vmul.f32 %v2442_v11, %v240_v15 }
 0x10b   :  { %v245_v21 = vmul.f32 0.0, %v242_v16  ;;  %v244_v29 = vadd.f32 0.5, %v243_v28  ;;  %v952_v28 = vld [vmem:[%s3471_s1] sm:$0xff] }
 0x10d   :  { %v2878_v24 = vadd.f32 %v246_v20, %v245_v21 }
 0x10f   :  { %2445 = vtanh.f32 %v2878_v24 }
 0x119   :  { %v2446_v32 = vpop.eup %2445 }
 0x11a   :  { %v249_v33 = vmul.f32 %v2446_v32, %v244_v29  ;;  %v956_v29 = vld [vmem:[%s3471_s1 + $0x20] sm:$0xff] }
 0x11c   :  { %250 = vst [vmem:[%s3473_s2] sm:$0xff] %v249_v33  ;;  %385 = vmatmul.mubr.f32.vlgmr.msra.gmra.mrb[2].mxu0 %v249_v33  ;;  %456 = vmatmul.mubr.f32.vlgmr.msra.gmra.mrb[2].mxu1 %v249_v33  ;;  %v3012_v33 = vpack.c.bf16 %v956_v29, %v952_v28  ;;  %v996_v28 = vld [vmem:[%s3471_s1 + $0x160] sm:$0xff] }
 0x11d   :  { %2055 = vmatpush1.bf16.msra.mxu0 %v2560_v8  ;;  %2087 = vmatpush1.bf16.msra.mxu1 %v2588_v18 }
 0x11e   :  { %2057 = vmatprep.subr.bf16.mxu0 %v2562_v9  ;;  %2089 = vmatprep.subr.bf16.mxu1 %v2613_v26 }
 0x11f   :  { %616 = vmatprep.mubr.f32.mxu0 %v2517_v3  ;;  %687 = vmatprep.mubr.f32.mxu1 %v2517_v3 }
 0x121   :  { %2059 = vmatpush1.bf16.msra.mxu0 %v2586_v17  ;;  %2091 = vmatpush1.bf16.msra.mxu1 %v2624_v30 }
 0x122   :  { %2061 = vmatprep.subr.bf16.mxu0 %v2601_v22  ;;  %2093 = vmatprep.subr.bf16.mxu1 %v2639_v35 }
 0x125   :  { %2063 = vmatpush1.bf16.msra.mxu0 %v2637_v34  ;;  %2095 = vmatpush1.bf16.msra.mxu1 %v2660_v42 }
 0x126   :  { %2065 = vmatprep.subr.bf16.mxu0 %v2648_v38  ;;  %2097 = vmatprep.subr.bf16.mxu1 %v2672_v46 }
 0x129   :  { %2067 = vmatpush1.bf16.msra.mxu0 %v2681_v49  ;;  %2099 = vmatpush1.bf16.msra.mxu1 %v2699_v55 }
 0x12a   :  { %2069 = vmatprep.subr.bf16.mxu0 %v2687_v51  ;;  %2101 = vmatprep.subr.bf16.mxu1 %v2708_v58 }
 0x12d   :  { %2071 = vmatpush1.bf16.msra.mxu0 %v2717_v61  ;;  %2103 = vmatpush1.bf16.msra.mxu1 %v2735_v5 }
 0x12e   :  { %2073 = vmatprep.subr.bf16.mxu0 %v2726_v0  ;;  %2105 = vmatprep.subr.bf16.mxu1 %v2744_v10 }
 0x131   :  { %2075 = vmatpush1.bf16.msra.mxu0 %v2753_v14  ;;  %2107 = vmatpush1.bf16.msra.mxu1 %v2771_v23 }
 0x132   :  { %2077 = vmatprep.subr.bf16.mxu0 %v2762_v19  ;;  %2109 = vmatprep.subr.bf16.mxu1 %v2780_v27 }
 0x135   :  { %2079 = vmatpush1.bf16.msra.mxu0 %v2789_v31  ;;  %2111 = vmatpush1.bf16.msra.mxu1 %v2807_v40 }
 0x136   :  { %2081 = vmatprep.subr.bf16.mxu0 %v2798_v36  ;;  %2113 = vmatprep.subr.bf16.mxu1 %v2810_v41 }
 0x139   :  { %2083 = vmatpush1.bf16.msra.mxu0 %v2819_v45  ;;  %2115 = vmatpush1.bf16.msra.mxu1 %v2823_v47 }
 0x13a   :  { %2117 = vmatprep.subr.bf16.mxu0 %v2549_v4  ;;  %2149 = vmatprep.subr.bf16.mxu1 %v2574_v13 }
 0x1ef   :  { %v386_v43 = vpop.f32.mrb[2].mxu0  ;;  %v457_v48 = vpop.f32.mrb[2].mxu1 }
 0x1f0   :  { %v462_v50 = vadd.f32 %v1889_v37, %v386_v43  ;;  %v388_v52 = vpop.f32.mrb[3].mxu0  ;;  %v459_v53 = vpop.f32.mrb[3].mxu1  ;;  %v464_v13 = vadd.f32 %v1891_v44, %v457_v48  ;;  %v954_v37 = vld [vmem:[%s3471_s1 + $0x10] sm:$0xff]  ;;  %v961_v44 = vld [vmem:[%s3471_s1 + $0x48] sm:$0xff] }
 0x1f1   :  { %v463_v4 = vadd.f32 %v1890_v39, %v388_v52  ;;  %v465_v56 = vadd.f32 %v1892_v54, %v459_v53  ;;  %v958_v39 = vld [vmem:[%s3471_s1 + $0x30] sm:$0xff]  ;;  %v965_v48 = vld [vmem:[%s3471_s1 + $0x68] sm:$0xff]  ;;  %v967_v53 = vld [vmem:[%s3471_s1 + $0x78] sm:$0xff] }
 0x1f2   :  { %2447 = vtanh.f32 %v462_v50  ;;  %v3021_v43 = vpack.c.bf16 %v958_v39, %v954_v37  ;;  %v963_v50 = vld [vmem:[%s3471_s1 + $0x58] sm:$0xff]  ;;  %v3035_v52 = vpack.c.bf16 %v965_v48, %v961_v44  ;;  %v994_v39 = vld [vmem:[%s3471_s1 + $0x150] sm:$0xff] }
 0x1f3   :  { %2449 = vtanh.f32 %v463_v4  ;;  %v960_v4 = vld [vmem:[%s3471_s1 + $0x40] sm:$0xff]  ;;  %v3046_v54 = vpack.c.bf16 %v967_v53, %v963_v50  ;;  %v998_v44 = vld [vmem:[%s3471_s1 + $0x170] sm:$0xff]  ;;  %v1001_v50 = vld [vmem:[%s3471_s1 + $0x188] sm:$0xff] }
 0x1f4   :  { %2451 = vtanh.f32 %v464_v13  ;;  %v964_v13 = vld [vmem:[%s3471_s1 + $0x60] sm:$0xff]  ;;  %v3201_v48 = vpack.c.bf16 %v998_v44, %v994_v39  ;;  %v1005_v53 = vld [vmem:[%s3471_s1 + $0x1a8] sm:$0xff] }
 0x1f5   :  { %2453 = vtanh.f32 %v465_v56  ;;  %v3048_v56 = vpack.c.bf16 %v964_v13, %v960_v4  ;;  %v1003_v4 = vld [vmem:[%s3471_s1 + $0x198] sm:$0xff]  ;;  %v3215_v13 = vpack.c.bf16 %v1005_v53, %v1001_v50 }
 0x1fc   :  { %v2448_v57 = vpop.eup %2447 }
 0x1fd   :  { %v470_v59 = vmul.f32 0.5, %v2448_v57  ;;  %v2450_v60 = vpop.eup %2449  ;;  %v962_v57 = vld [vmem:[%s3471_s1 + $0x50] sm:$0xff] }
 0x1fe   :  { %v472_v63 = vmul.f32 0.5, %v2450_v60  ;;  %v2452_v1 = vpop.eup %2451 }
 0x1ff   :  { %v471_v62 = vadd.f32 0.5, %v470_v59  ;;  %v2454_v12 = vpop.eup %2453  ;;  %v966_v59 = vld [vmem:[%s3471_s1 + $0x70] sm:$0xff] }
 0x200   :  { %v473_v2 = vadd.f32 0.5, %v472_v63  ;;  %v474_v15 = vmul.f32 0.5, %v2454_v12  ;;  %v3057_v60 = vpack.c.bf16 %v966_v59, %v962_v57  ;;  %v973_v63 = vld [vmem:[%s3471_s1 + $0xa8] sm:$0xff]  ;;  %v1007_v57 = vld [vmem:[%s3471_s1 + $0x1b8] sm:$0xff]  ;;  %v1000_v59 = vld [vmem:[%s3471_s1 + $0x180] sm:$0xff] }
 0x201   :  { %v477_v6 = vmul.f32 %v2452_v1, %v471_v62  ;;  %v969_v62 = vld [vmem:[%s3471_s1 + $0x88] sm:$0xff]  ;;  %v971_v1 = vld [vmem:[%s3471_s1 + $0x98] sm:$0xff] }
 0x202   :  { %v476_v7 = vmul.f32 %v473_v2, %v2878_v24  ;;  %v475_v16 = vadd.f32 0.5, %v474_v15  ;;  %v3071_v2 = vpack.c.bf16 %v973_v63, %v969_v62  ;;  %v1004_v62 = vld [vmem:[%s3471_s1 + $0x1a0] sm:$0xff]  ;;  %v3226_v63 = vpack.c.bf16 %v1007_v57, %v1003_v4 }
 0x204   :  { %v2931_v11 = vadd.f32 %v477_v6, %v476_v7  ;;  %v975_v6 = vld [vmem:[%s3471_s1 + $0xb8] sm:$0xff]  ;;  %v968_v7 = vld [vmem:[%s3471_s1 + $0x80] sm:$0xff] }
 0x205   :  { %v3082_v12 = vpack.c.bf16 %v975_v6, %v971_v1  ;;  %v3228_v1 = vpack.c.bf16 %v1004_v62, %v1000_v59  ;;  %v1002_v6 = vld [vmem:[%s3471_s1 + $0x190] sm:$0xff] }
 0x206   :  { %2455 = vtanh.f32 %v2931_v11 }
 0x210   :  { %v2456_v20 = vpop.eup %2455 }
 0x211   :  { %v480_v21 = vmul.f32 %v2456_v20, %v475_v16  ;;  %v970_v16 = vld [vmem:[%s3471_s1 + $0x90] sm:$0xff] }
 0x212   :  { %v974_v20 = vld [vmem:[%s3471_s1 + $0xb0] sm:$0xff] }
 0x213   :  { %1893 = vst [vmem:[%s3473_s2 + $0x8] sm:$0xff] %v480_v21  ;;  %617 = vmatmul.mubr.f32.vlgmr.msra.gmra.mrb[4].mxu0 %v480_v21  ;;  %688 = vmatmul.mubr.f32.vlgmr.msra.gmra.mrb[4].mxu1 %v480_v21  ;;  %v3093_v21 = vpack.c.bf16 %v974_v20, %v970_v16  ;;  %v1009_v16 = vld [vmem:[%s3471_s1 + $0x1c8] sm:$0xff] }
 0x214   :  { %2119 = vmatpush1.bf16.msra.mxu0 %v2560_v8  ;;  %2151 = vmatpush1.bf16.msra.mxu1 %v2588_v18  ;;  %v1894_v8 = vld [vmem:[%s3472_s0 + $0x40] sm:$0xff]  ;;  %v1896_v18 = vld [vmem:[%s3472_s0 + $0x50] sm:$0xff]  ;;  %v1013_v20 = vld [vmem:[%s3471_s1 + $0x1e8] sm:$0xff] }
 0x215   :  { %2121 = vmatprep.subr.bf16.mxu0 %v2562_v9  ;;  %2153 = vmatprep.subr.bf16.mxu1 %v2613_v26  ;;  %v1895_v9 = vld [vmem:[%s3472_s0 + $0x48] sm:$0xff] }
 0x216   :  { %848 = vmatprep.mubr.f32.mxu0 %v2517_v3  ;;  %919 = vmatprep.mubr.f32.mxu1 %v2517_v3 }
 0x218   :  { %2123 = vmatpush1.bf16.msra.mxu0 %v2586_v17  ;;  %2155 = vmatpush1.bf16.msra.mxu1 %v2624_v30 }
 0x219   :  { %2125 = vmatprep.subr.bf16.mxu0 %v2601_v22  ;;  %2157 = vmatprep.subr.bf16.mxu1 %v2639_v35 }
 0x21c   :  { %2127 = vmatpush1.bf16.msra.mxu0 %v2637_v34  ;;  %2159 = vmatpush1.bf16.msra.mxu1 %v2660_v42  ;;  %v1897_v42 = vld [vmem:[%s3472_s0 + $0x58] sm:$0xff] }
 0x21d   :  { %2129 = vmatprep.subr.bf16.mxu0 %v2648_v38  ;;  %2161 = vmatprep.subr.bf16.mxu1 %v2672_v46 }
 0x220   :  { %2131 = vmatpush1.bf16.msra.mxu0 %v2681_v49  ;;  %2163 = vmatpush1.bf16.msra.mxu1 %v2699_v55 }
 0x221   :  { %2133 = vmatprep.subr.bf16.mxu0 %v2687_v51  ;;  %2165 = vmatprep.subr.bf16.mxu1 %v2708_v58 }
 0x224   :  { %2135 = vmatpush1.bf16.msra.mxu0 %v2717_v61  ;;  %2167 = vmatpush1.bf16.msra.mxu1 %v2735_v5 }
 0x225   :  { %2137 = vmatprep.subr.bf16.mxu0 %v2726_v0  ;;  %2169 = vmatprep.subr.bf16.mxu1 %v2744_v10 }
 0x228   :  { %2139 = vmatpush1.bf16.msra.mxu0 %v2753_v14  ;;  %2171 = vmatpush1.bf16.msra.mxu1 %v2771_v23 }
 0x229   :  { %2141 = vmatprep.subr.bf16.mxu0 %v2762_v19  ;;  %2173 = vmatprep.subr.bf16.mxu1 %v2780_v27 }
 0x22c   :  { %2143 = vmatpush1.bf16.msra.mxu0 %v2789_v31  ;;  %2175 = vmatpush1.bf16.msra.mxu1 %v2807_v40 }
 0x22d   :  { %2145 = vmatprep.subr.bf16.mxu0 %v2798_v36  ;;  %2177 = vmatprep.subr.bf16.mxu1 %v2810_v41  ;;  %v953_v41 = vld [vmem:[%s3471_s1 + $0x8] sm:$0xff] }
 0x230   :  { %2147 = vmatpush1.bf16.msra.mxu0 %v2819_v45  ;;  %2179 = vmatpush1.bf16.msra.mxu1 %v2823_v47  ;;  %v957_v45 = vld [vmem:[%s3471_s1 + $0x28] sm:$0xff]  ;;  %v955_v47 = vld [vmem:[%s3471_s1 + $0x18] sm:$0xff] }
 0x231   :  { %v2999_v24 = vpack.c.bf16 %v957_v45, %v953_v41  ;;  %v3010_v32 = vpack.c.bf16 %v959_v25, %v955_v47  ;;  %v995_v41 = vld [vmem:[%s3471_s1 + $0x158] sm:$0xff]  ;;  %v992_v25 = vld [vmem:[%s3471_s1 + $0x140] sm:$0xff] }
 0x232   :  { %v999_v47 = vld [vmem:[%s3471_s1 + $0x178] sm:$0xff]  ;;  %v3192_v37 = vpack.c.bf16 %v996_v28, %v992_v25 }
 0x233   :  { %2181 = vmatprep.subr.bf16.mxu0 %v2999_v24  ;;  %2213 = vmatprep.subr.bf16.mxu1 %v3010_v32  ;;  %v3190_v29 = vpack.c.bf16 %v999_v47, %v995_v41  ;;  %v1902_v25 = vld [vmem:[%s3472_s0 + $0x78] sm:$0xff] }
 0x2e6   :  { %v618_v17 = vpop.f32.mrb[4].mxu0  ;;  %v689_v22 = vpop.f32.mrb[4].mxu1 }
 0x2e7   :  { %v694_v26 = vadd.f32 %v1894_v8, %v618_v17  ;;  %v620_v30 = vpop.f32.mrb[5].mxu0  ;;  %v691_v34 = vpop.f32.mrb[5].mxu1  ;;  %v696_v38 = vadd.f32 %v1896_v18, %v689_v22  ;;  %v977_v8 = vld [vmem:[%s3471_s1 + $0xc8] sm:$0xff]  ;;  %v979_v17 = vld [vmem:[%s3471_s1 + $0xd8] sm:$0xff] }
 0x2e8   :  { %v695_v35 = vadd.f32 %v1895_v9, %v620_v30  ;;  %v697_v46 = vadd.f32 %v1897_v42, %v691_v34  ;;  %v981_v9 = vld [vmem:[%s3471_s1 + $0xe8] sm:$0xff]  ;;  %v983_v22 = vld [vmem:[%s3471_s1 + $0xf8] sm:$0xff]  ;;  %v980_v30 = vld [vmem:[%s3471_s1 + $0xe0] sm:$0xff] }
 0x2e9   :  { %2457 = vtanh.f32 %v694_v26  ;;  %v3107_v18 = vpack.c.bf16 %v981_v9, %v977_v8  ;;  %v976_v26 = vld [vmem:[%s3471_s1 + $0xc0] sm:$0xff]  ;;  %v3118_v34 = vpack.c.bf16 %v983_v22, %v979_v17  ;;  %v982_v42 = vld [vmem:[%s3471_s1 + $0xf0] sm:$0xff]  ;;  %v1011_v8 = vld [vmem:[%s3471_s1 + $0x1d8] sm:$0xff]  ;;  %v3251_v9 = vpack.c.bf16 %v1013_v20, %v1009_v16 }
 0x2ea   :  { %2459 = vtanh.f32 %v695_v35  ;;  %v3120_v35 = vpack.c.bf16 %v980_v30, %v976_v26  ;;  %v1015_v17 = vld [vmem:[%s3471_s1 + $0x1f8] sm:$0xff]  ;;  %v1008_v22 = vld [vmem:[%s3471_s1 + $0x1c0] sm:$0xff] }
 0x2eb   :  { %2461 = vtanh.f32 %v696_v38  ;;  %v978_v38 = vld [vmem:[%s3471_s1 + $0xd0] sm:$0xff]  ;;  %v1012_v26 = vld [vmem:[%s3471_s1 + $0x1e0] sm:$0xff]  ;;  %v3262_v30 = vpack.c.bf16 %v1015_v17, %v1011_v8 }
 0x2ec   :  { %2463 = vtanh.f32 %v697_v46  ;;  %v3129_v46 = vpack.c.bf16 %v982_v42, %v978_v38  ;;  %v3264_v38 = vpack.c.bf16 %v1012_v26, %v1008_v22  ;;  %v1010_v42 = vld [vmem:[%s3471_s1 + $0x1d0] sm:$0xff]  ;;  %v1905_v26 = vld [vmem:[%s3472_s0 + $0x88] sm:$0xff] }
 0x2f3   :  { %v2458_v49 = vpop.eup %2457 }
 0x2f4   :  { %v702_v51 = vmul.f32 0.5, %v2458_v49  ;;  %v2460_v55 = vpop.eup %2459  ;;  %v985_v49 = vld [vmem:[%s3471_s1 + $0x108] sm:$0xff] }
 0x2f5   :  { %v704_v61 = vmul.f32 0.5, %v2460_v55  ;;  %v2462_v0 = vpop.eup %2461  ;;  %v987_v55 = vld [vmem:[%s3471_s1 + $0x118] sm:$0xff] }
 0x2f6   :  { %v703_v58 = vadd.f32 0.5, %v702_v51  ;;  %v2464_v23 = vpop.eup %2463  ;;  %v989_v51 = vld [vmem:[%s3471_s1 + $0x128] sm:$0xff] }
 0x2f7   :  { %v705_v5 = vadd.f32 0.5, %v704_v61  ;;  %v706_v27 = vmul.f32 0.5, %v2464_v23  ;;  %v991_v61 = vld [vmem:[%s3471_s1 + $0x138] sm:$0xff]  ;;  %v986_v23 = vld [vmem:[%s3471_s1 + $0x110] sm:$0xff] }
 0x2f8   :  { %v709_v10 = vmul.f32 %v2462_v0, %v703_v58  ;;  %v3143_v58 = vpack.c.bf16 %v989_v51, %v985_v49  ;;  %v984_v0 = vld [vmem:[%s3471_s1 + $0x100] sm:$0xff]  ;;  %v1014_v49 = vld [vmem:[%s3471_s1 + $0x1f0] sm:$0xff] }
 0x2f9   :  { %v708_v14 = vmul.f32 %v705_v5, %v2931_v11  ;;  %v707_v31 = vadd.f32 0.5, %v706_v27  ;;  %v972_v11 = vld [vmem:[%s3471_s1 + $0xa0] sm:$0xff]  ;;  %v990_v27 = vld [vmem:[%s3471_s1 + $0x130] sm:$0xff]  ;;  %v3273_v51 = vpack.c.bf16 %v1014_v49, %v1010_v42 }
 0x2fa   :  { %v3084_v15 = vpack.c.bf16 %v972_v11, %v968_v7  ;;  %v988_v5 = vld [vmem:[%s3471_s1 + $0x120] sm:$0xff]  ;;  %v1006_v7 = vld [vmem:[%s3471_s1 + $0x1b0] sm:$0xff] }
 0x2fb   :  { %v2982_v19 = vadd.f32 %v709_v10, %v708_v14  ;;  %v3154_v10 = vpack.c.bf16 %v991_v61, %v987_v55  ;;  %v3156_v14 = vpack.c.bf16 %v988_v5, %v984_v0  ;;  %v3237_v11 = vpack.c.bf16 %v1006_v7, %v1002_v6  ;;  %v1899_v55 = vld [vmem:[%s3472_s0 + $0x60] sm:$0xff]  ;;  %v1900_v61 = vld [vmem:[%s3472_s0 + $0x68] sm:$0xff]  ;;  %v1901_v5 = vld [vmem:[%s3472_s0 + $0x70] sm:$0xff] }
 0x2fc   :  { %v1906_v49 = vld [vmem:[%s3472_s0 + $0x90] sm:$0xff] }
 0x2fd   :  { %2465 = vtanh.f32 %v2982_v19 }
 0x307   :  { %v2466_v36 = vpop.eup %2465 }
 0x308   :  { %v712_v40 = vmul.f32 %v2466_v36, %v707_v31  ;;  %v3165_v31 = vpack.c.bf16 %v990_v27, %v986_v23  ;;  %v993_v36 = vld [vmem:[%s3471_s1 + $0x148] sm:$0xff] }
 0x30a   :  { %1898 = vst [vmem:[%s3473_s2 + $0x10] sm:$0xff] %v712_v40  ;;  %849 = vmatmul.mubr.f32.vlgmr.msra.gmra.mrb[6].mxu0 %v712_v40  ;;  %920 = vmatmul.mubr.f32.vlgmr.msra.gmra.mrb[6].mxu1 %v712_v40  ;;  %v997_v40 = vld [vmem:[%s3471_s1 + $0x168] sm:$0xff] }
 0x30b   :  { %1080 = vmatprep.mubr.f32.mxu0 %v2517_v3  ;;  %1151 = vmatprep.mubr.f32.mxu1 %v2517_v3  ;;  %v3179_v45 = vpack.c.bf16 %v997_v40, %v993_v36 }
 0x30c   :  { %2183 = vmatpush1.bf16.msra.mxu0 %v3012_v33  ;;  %2215 = vmatpush1.bf16.msra.mxu1 %v3021_v43 }
 0x30d   :  { %2185 = vmatprep.subr.bf16.mxu0 %v3035_v52  ;;  %2217 = vmatprep.subr.bf16.mxu1 %v3046_v54 }
 0x310   :  { %2187 = vmatpush1.bf16.msra.mxu0 %v3048_v56  ;;  %2219 = vmatpush1.bf16.msra.mxu1 %v3057_v60 }
 0x311   :  { %2189 = vmatprep.subr.bf16.mxu0 %v3071_v2  ;;  %2221 = vmatprep.subr.bf16.mxu1 %v3082_v12 }
 0x314   :  { %2191 = vmatpush1.bf16.msra.mxu0 %v3084_v15  ;;  %2223 = vmatpush1.bf16.msra.mxu1 %v3093_v21 }
 0x315   :  { %2193 = vmatprep.subr.bf16.mxu0 %v3107_v18  ;;  %2225 = vmatprep.subr.bf16.mxu1 %v3118_v34 }
 0x318   :  { %2195 = vmatpush1.bf16.msra.mxu0 %v3120_v35  ;;  %2227 = vmatpush1.bf16.msra.mxu1 %v3129_v46 }
 0x319   :  { %2197 = vmatprep.subr.bf16.mxu0 %v3143_v58  ;;  %2229 = vmatprep.subr.bf16.mxu1 %v3154_v10 }
 0x31c   :  { %2199 = vmatpush1.bf16.msra.mxu0 %v3156_v14  ;;  %2231 = vmatpush1.bf16.msra.mxu1 %v3165_v31 }
 0x31d   :  { %2201 = vmatprep.subr.bf16.mxu0 %v3179_v45  ;;  %2233 = vmatprep.subr.bf16.mxu1 %v3190_v29 }
 0x320   :  { %2203 = vmatpush1.bf16.msra.mxu0 %v3192_v37  ;;  %2235 = vmatpush1.bf16.msra.mxu1 %v3201_v48 }
 0x321   :  { %2205 = vmatprep.subr.bf16.mxu0 %v3215_v13  ;;  %2237 = vmatprep.subr.bf16.mxu1 %v3226_v63 }
 0x324   :  { %2207 = vmatpush1.bf16.msra.mxu0 %v3228_v1  ;;  %2239 = vmatpush1.bf16.msra.mxu1 %v3237_v11 }
 0x325   :  { %2209 = vmatprep.subr.bf16.mxu0 %v3251_v9  ;;  %2241 = vmatprep.subr.bf16.mxu1 %v3262_v30 }
 0x328   :  { %2211 = vmatpush1.bf16.msra.mxu0 %v3264_v38  ;;  %2243 = vmatpush1.bf16.msra.mxu1 %v3273_v51 }
 0x329   :  { %2245 = vmatprep.subr.bf16.mxu0 %v2999_v24  ;;  %2277 = vmatprep.subr.bf16.mxu1 %v3010_v32 }
 0x3dd   :  { %v850_v0 = vpop.f32.mrb[6].mxu0  ;;  %v921_v23 = vpop.f32.mrb[6].mxu1 }
 0x3de   :  { %v926_v27 = vadd.f32 %v1899_v55, %v850_v0  ;;  %v852_v36 = vpop.f32.mrb[7].mxu0  ;;  %v923_v40 = vpop.f32.mrb[7].mxu1  ;;  %v928_v47 = vadd.f32 %v1901_v5, %v921_v23 }
 0x3df   :  { %v927_v41 = vadd.f32 %v1900_v61, %v852_v36  ;;  %v929_v28 = vadd.f32 %v1902_v25, %v923_v40  ;;  %v1907_v36 = vld [vmem:[%s3472_s0 + $0x98] sm:$0xff] }
 0x3e0   :  { %2467 = vtanh.f32 %v926_v27 }
 0x3e1   :  { %2469 = vtanh.f32 %v927_v41 }
 0x3e2   :  { %2471 = vtanh.f32 %v928_v47 }
 0x3e3   :  { %2473 = vtanh.f32 %v929_v28 }
 0x3ea   :  { %v2468_v39 = vpop.eup %2467 }
 0x3eb   :  { %v934_v44 = vmul.f32 0.5, %v2468_v39  ;;  %v2470_v50 = vpop.eup %2469 }
 0x3ec   :  { %v936_v4 = vmul.f32 0.5, %v2470_v50  ;;  %v2472_v57 = vpop.eup %2471 }
 0x3ed   :  { %v935_v53 = vadd.f32 0.5, %v934_v44  ;;  %v2474_v16 = vpop.eup %2473 }
 0x3ee   :  { %v937_v59 = vadd.f32 0.5, %v936_v4  ;;  %v938_v20 = vmul.f32 0.5, %v2474_v16 }
 0x3ef   :  { %v941_v62 = vmul.f32 %v2472_v57, %v935_v53 }
 0x3f0   :  { %v940_v6 = vmul.f32 %v937_v59, %v2982_v19  ;;  %v939_v8 = vadd.f32 0.5, %v938_v20  ;;  %v1904_v19 = vld [vmem:[%s3472_s0 + $0x80] sm:$0xff] }
 0x3f2   :  { %v3293_v7 = vadd.f32 %v941_v62, %v940_v6 }
 0x3f4   :  { %2475 = vtanh.f32 %v3293_v7 }
 0x3fe   :  { %v2476_v17 = vpop.eup %2475 }
 0x3ff   :  { %v944_v22 = vmul.f32 %v2476_v17, %v939_v8  ;;  %v1910_v8 = vld [vmem:[%s3472_s0 + $0xa8] sm:$0xff] }
 0x401   :  { %1903 = vst [vmem:[%s3473_s2 + $0x18] sm:$0xff] %v944_v22  ;;  %1081 = vmatmul.mubr.f32.vlgmr.msra.gmra.mrb[8].mxu0 %v944_v22  ;;  %1152 = vmatmul.mubr.f32.vlgmr.msra.gmra.mrb[8].mxu1 %v944_v22  ;;  %v1911_v22 = vld [vmem:[%s3472_s0 + $0xb0] sm:$0xff] }
 0x402   :  { %2247 = vmatpush1.bf16.msra.mxu0 %v3012_v33  ;;  %2279 = vmatpush1.bf16.msra.mxu1 %v3021_v43 }
 0x403   :  { %2249 = vmatprep.subr.bf16.mxu0 %v3035_v52  ;;  %2281 = vmatprep.subr.bf16.mxu1 %v3046_v54 }
 0x404   :  { %1312 = vmatprep.mubr.f32.mxu0 %v2517_v3  ;;  %1383 = vmatprep.mubr.f32.mxu1 %v2517_v3 }
 0x406   :  { %2251 = vmatpush1.bf16.msra.mxu0 %v3048_v56  ;;  %2283 = vmatpush1.bf16.msra.mxu1 %v3057_v60 }
 0x407   :  { %2253 = vmatprep.subr.bf16.mxu0 %v3071_v2  ;;  %2285 = vmatprep.subr.bf16.mxu1 %v3082_v12 }
 0x40a   :  { %2255 = vmatpush1.bf16.msra.mxu0 %v3084_v15  ;;  %2287 = vmatpush1.bf16.msra.mxu1 %v3093_v21 }
 0x40b   :  { %2257 = vmatprep.subr.bf16.mxu0 %v3107_v18  ;;  %2289 = vmatprep.subr.bf16.mxu1 %v3118_v34 }
 0x40e   :  { %2259 = vmatpush1.bf16.msra.mxu0 %v3120_v35  ;;  %2291 = vmatpush1.bf16.msra.mxu1 %v3129_v46 }
 0x40f   :  { %2261 = vmatprep.subr.bf16.mxu0 %v3143_v58  ;;  %2293 = vmatprep.subr.bf16.mxu1 %v3154_v10 }
 0x412   :  { %2263 = vmatpush1.bf16.msra.mxu0 %v3156_v14  ;;  %2295 = vmatpush1.bf16.msra.mxu1 %v3165_v31 }
 0x413   :  { %2265 = vmatprep.subr.bf16.mxu0 %v3179_v45  ;;  %2297 = vmatprep.subr.bf16.mxu1 %v3190_v29 }
 0x416   :  { %2267 = vmatpush1.bf16.msra.mxu0 %v3192_v37  ;;  %2299 = vmatpush1.bf16.msra.mxu1 %v3201_v48 }
 0x417   :  { %2269 = vmatprep.subr.bf16.mxu0 %v3215_v13  ;;  %2301 = vmatprep.subr.bf16.mxu1 %v3226_v63 }
 0x41a   :  { %2271 = vmatpush1.bf16.msra.mxu0 %v3228_v1  ;;  %2303 = vmatpush1.bf16.msra.mxu1 %v3237_v11 }
 0x41b   :  { %2273 = vmatprep.subr.bf16.mxu0 %v3251_v9  ;;  %2305 = vmatprep.subr.bf16.mxu1 %v3262_v30 }
 0x41e   :  { %2275 = vmatpush1.bf16.msra.mxu0 %v3264_v38  ;;  %2307 = vmatpush1.bf16.msra.mxu1 %v3273_v51 }
 0x41f   :  { %2309 = vmatprep.subr.bf16.mxu0 %v2999_v24  ;;  %2341 = vmatprep.subr.bf16.mxu1 %v3010_v32 }
 0x4d4   :  { %v1082_v42 = vpop.f32.mrb[8].mxu0  ;;  %v1153_v55 = vpop.f32.mrb[8].mxu1 }
 0x4d5   :  { %v1158_v61 = vadd.f32 %v1904_v19, %v1082_v42  ;;  %v1084_v0 = vpop.f32.mrb[9].mxu0  ;;  %v1155_v5 = vpop.f32.mrb[9].mxu1  ;;  %v1160_v27 = vadd.f32 %v1906_v49, %v1153_v55  ;;  %v1912_v55 = vld [vmem:[%s3472_s0 + $0xb8] sm:$0xff] }
 0x4d6   :  { %v1159_v23 = vadd.f32 %v1905_v26, %v1084_v0  ;;  %v1161_v40 = vadd.f32 %v1907_v36, %v1155_v5 }
 0x4d7   :  { %2477 = vtanh.f32 %v1158_v61 }
 0x4d8   :  { %2479 = vtanh.f32 %v1159_v23 }
 0x4d9   :  { %2481 = vtanh.f32 %v1160_v27 }
 0x4da   :  { %2483 = vtanh.f32 %v1161_v40 }
 0x4e1   :  { %v2478_v41 = vpop.eup %2477 }
 0x4e2   :  { %v1166_v47 = vmul.f32 0.5, %v2478_v41  ;;  %v2480_v25 = vpop.eup %2479 }
 0x4e3   :  { %v1168_v39 = vmul.f32 0.5, %v2480_v25  ;;  %v2482_v44 = vpop.eup %2481 }
 0x4e4   :  { %v1167_v28 = vadd.f32 0.5, %v1166_v47  ;;  %v2484_v59 = vpop.eup %2483 }
 0x4e5   :  { %v1169_v50 = vadd.f32 0.5, %v1168_v39  ;;  %v1170_v62 = vmul.f32 0.5, %v2484_v59 }
 0x4e6   :  { %v1173_v53 = vmul.f32 %v2482_v44, %v1167_v28 }
 0x4e7   :  { %v1172_v4 = vmul.f32 %v1169_v50, %v3293_v7  ;;  %v1171_v6 = vadd.f32 0.5, %v1170_v62  ;;  %v1909_v7 = vld [vmem:[%s3472_s0 + $0xa0] sm:$0xff] }
 0x4e9   :  { %v3346_v57 = vadd.f32 %v1173_v53, %v1172_v4 }
 0x4eb   :  { %2485 = vtanh.f32 %v3346_v57 }
 0x4f5   :  { %v2486_v16 = vpop.eup %2485 }
 0x4f6   :  { %v1176_v20 = vmul.f32 %v2486_v16, %v1171_v6 }
 0x4f8   :  { %1908 = vst [vmem:[%s3473_s2 + $0x20] sm:$0xff] %v1176_v20  ;;  %1313 = vmatmul.mubr.f32.vlgmr.msra.gmra.mrb[10].mxu0 %v1176_v20  ;;  %1384 = vmatmul.mubr.f32.vlgmr.msra.gmra.mrb[10].mxu1 %v1176_v20 }
 0x4f9   :  { %2311 = vmatpush1.bf16.msra.mxu0 %v3012_v33  ;;  %2343 = vmatpush1.bf16.msra.mxu1 %v3021_v43 }
 0x4fa   :  { %2313 = vmatprep.subr.bf16.mxu0 %v3035_v52  ;;  %2345 = vmatprep.subr.bf16.mxu1 %v3046_v54 }
 0x4fb   :  { %1544 = vmatprep.mubr.f32.mxu0 %v2517_v3  ;;  %1615 = vmatprep.mubr.f32.mxu1 %v2517_v3 }
 0x4fd   :  { %2315 = vmatpush1.bf16.msra.mxu0 %v3048_v56  ;;  %2347 = vmatpush1.bf16.msra.mxu1 %v3057_v60 }
 0x4fe   :  { %2317 = vmatprep.subr.bf16.mxu0 %v3071_v2  ;;  %2349 = vmatprep.subr.bf16.mxu1 %v3082_v12 }
 0x501   :  { %2319 = vmatpush1.bf16.msra.mxu0 %v3084_v15  ;;  %2351 = vmatpush1.bf16.msra.mxu1 %v3093_v21 }
 0x502   :  { %2321 = vmatprep.subr.bf16.mxu0 %v3107_v18  ;;  %2353 = vmatprep.subr.bf16.mxu1 %v3118_v34 }
 0x505   :  { %2323 = vmatpush1.bf16.msra.mxu0 %v3120_v35  ;;  %2355 = vmatpush1.bf16.msra.mxu1 %v3129_v46 }
 0x506   :  { %2325 = vmatprep.subr.bf16.mxu0 %v3143_v58  ;;  %2357 = vmatprep.subr.bf16.mxu1 %v3154_v10 }
 0x509   :  { %2327 = vmatpush1.bf16.msra.mxu0 %v3156_v14  ;;  %2359 = vmatpush1.bf16.msra.mxu1 %v3165_v31 }
 0x50a   :  { %2329 = vmatprep.subr.bf16.mxu0 %v3179_v45  ;;  %2361 = vmatprep.subr.bf16.mxu1 %v3190_v29 }
 0x50d   :  { %2331 = vmatpush1.bf16.msra.mxu0 %v3192_v37  ;;  %2363 = vmatpush1.bf16.msra.mxu1 %v3201_v48 }
 0x50e   :  { %2333 = vmatprep.subr.bf16.mxu0 %v3215_v13  ;;  %2365 = vmatprep.subr.bf16.mxu1 %v3226_v63 }
 0x511   :  { %2335 = vmatpush1.bf16.msra.mxu0 %v3228_v1  ;;  %2367 = vmatpush1.bf16.msra.mxu1 %v3237_v11 }
 0x512   :  { %2337 = vmatprep.subr.bf16.mxu0 %v3251_v9  ;;  %2369 = vmatprep.subr.bf16.mxu1 %v3262_v30 }
 0x515   :  { %2339 = vmatpush1.bf16.msra.mxu0 %v3264_v38  ;;  %2371 = vmatpush1.bf16.msra.mxu1 %v3273_v51 }
 0x516   :  { %2373 = vmatprep.subr.bf16.mxu0 %v2999_v24  ;;  %2405 = vmatprep.subr.bf16.mxu1 %v3010_v32 }
 0x5cb   :  { %v1314_v17 = vpop.f32.mrb[10].mxu0  ;;  %v1385_v19 = vpop.f32.mrb[10].mxu1 }
 0x5cc   :  { %v1390_v26 = vadd.f32 %v1909_v7, %v1314_v17  ;;  %v1316_v42 = vpop.f32.mrb[11].mxu0  ;;  %v1387_v49 = vpop.f32.mrb[11].mxu1  ;;  %v1392_v32 = vadd.f32 %v1911_v22, %v1385_v19  ;;  %v1922_v7 = vld [vmem:[%s3472_s0 + $0xf8] sm:$0xff] }
 0x5cd   :  { %v1391_v24 = vadd.f32 %v1910_v8, %v1316_v42  ;;  %v1393_v61 = vadd.f32 %v1912_v55, %v1387_v49 }
 0x5ce   :  { %2487 = vtanh.f32 %v1390_v26 }
 0x5cf   :  { %2489 = vtanh.f32 %v1391_v24 }
 0x5d0   :  { %2491 = vtanh.f32 %v1392_v32 }
 0x5d1   :  { %2493 = vtanh.f32 %v1393_v61 }
 0x5d8   :  { %v2488_v0 = vpop.eup %2487 }
 0x5d9   :  { %v1398_v5 = vmul.f32 0.5, %v2488_v0  ;;  %v2490_v23 = vpop.eup %2489 }
 0x5da   :  { %v1400_v36 = vmul.f32 0.5, %v2490_v23  ;;  %v2492_v40 = vpop.eup %2491 }
 0x5db   :  { %v1399_v27 = vadd.f32 0.5, %v1398_v5  ;;  %v2494_v39 = vpop.eup %2493 }
 0x5dc   :  { %v1401_v41 = vadd.f32 0.5, %v1400_v36  ;;  %v1402_v44 = vmul.f32 0.5, %v2494_v39 }
 0x5dd   :  { %v1405_v47 = vmul.f32 %v2492_v40, %v1399_v27 }
 0x5de   :  { %v1404_v25 = vmul.f32 %v1401_v41, %v3346_v57  ;;  %v1403_v50 = vadd.f32 0.5, %v1402_v44 }
 0x5e0   :  { %v3399_v28 = vadd.f32 %v1405_v47, %v1404_v25 }
 0x5e2   :  { %2495 = vtanh.f32 %v3399_v28 }
 0x5ec   :  { %v2496_v53 = vpop.eup %2495 }
 0x5ed   :  { %v1408_v4 = vmul.f32 %v2496_v53, %v1403_v50 }
 0x5ef   :  { %1913 = vst [vmem:[%s3473_s2 + $0x28] sm:$0xff] %v1408_v4  ;;  %1545 = vmatmul.mubr.f32.vlgmr.msra.gmra.mrb[12].mxu0 %v1408_v4  ;;  %1616 = vmatmul.mubr.f32.vlgmr.msra.gmra.mrb[12].mxu1 %v1408_v4 }
 0x5f0   :  { %2375 = vmatpush1.bf16.msra.mxu0 %v3012_v33  ;;  %2407 = vmatpush1.bf16.msra.mxu1 %v3021_v43  ;;  %v1915_v33 = vld [vmem:[%s3472_s0 + $0xc8] sm:$0xff] }
 0x5f1   :  { %2377 = vmatprep.subr.bf16.mxu0 %v3035_v52  ;;  %2409 = vmatprep.subr.bf16.mxu1 %v3046_v54  ;;  %v1916_v52 = vld [vmem:[%s3472_s0 + $0xd0] sm:$0xff] }
 0x5f2   :  { %1776 = vmatprep.mubr.f32.mxu0 %v2517_v3  ;;  %1847 = vmatprep.mubr.f32.mxu1 %v2517_v3  ;;  %v1914_v3 = vld [vmem:[%s3472_s0 + $0xc0] sm:$0xff] }
 0x5f4   :  { %2379 = vmatpush1.bf16.msra.mxu0 %v3048_v56  ;;  %2411 = vmatpush1.bf16.msra.mxu1 %v3057_v60 }
 0x5f5   :  { %2381 = vmatprep.subr.bf16.mxu0 %v3071_v2  ;;  %2413 = vmatprep.subr.bf16.mxu1 %v3082_v12 }
 0x5f8   :  { %2383 = vmatpush1.bf16.msra.mxu0 %v3084_v15  ;;  %2415 = vmatpush1.bf16.msra.mxu1 %v3093_v21  ;;  %v1917_v21 = vld [vmem:[%s3472_s0 + $0xd8] sm:$0xff] }
 0x5f9   :  { %2385 = vmatprep.subr.bf16.mxu0 %v3107_v18  ;;  %2417 = vmatprep.subr.bf16.mxu1 %v3118_v34 }
 0x5fc   :  { %2387 = vmatpush1.bf16.msra.mxu0 %v3120_v35  ;;  %2419 = vmatpush1.bf16.msra.mxu1 %v3129_v46 }
 0x5fd   :  { %2389 = vmatprep.subr.bf16.mxu0 %v3143_v58  ;;  %2421 = vmatprep.subr.bf16.mxu1 %v3154_v10 }
 0x600   :  { %2391 = vmatpush1.bf16.msra.mxu0 %v3156_v14  ;;  %2423 = vmatpush1.bf16.msra.mxu1 %v3165_v31 }
 0x601   :  { %2393 = vmatprep.subr.bf16.mxu0 %v3179_v45  ;;  %2425 = vmatprep.subr.bf16.mxu1 %v3190_v29 }
 0x604   :  { %2395 = vmatpush1.bf16.msra.mxu0 %v3192_v37  ;;  %2427 = vmatpush1.bf16.msra.mxu1 %v3201_v48 }
 0x605   :  { %2397 = vmatprep.subr.bf16.mxu0 %v3215_v13  ;;  %2429 = vmatprep.subr.bf16.mxu1 %v3226_v63 }
 0x608   :  { %2399 = vmatpush1.bf16.msra.mxu0 %v3228_v1  ;;  %2431 = vmatpush1.bf16.msra.mxu1 %v3237_v11 }
 0x609   :  { %2401 = vmatprep.subr.bf16.mxu0 %v3251_v9  ;;  %2433 = vmatprep.subr.bf16.mxu1 %v3262_v30  ;;  %v1919_v9 = vld [vmem:[%s3472_s0 + $0xe0] sm:$0xff]  ;;  %v1920_v30 = vld [vmem:[%s3472_s0 + $0xe8] sm:$0xff] }
 0x60c   :  { %2403 = vmatpush1.bf16.msra.mxu0 %v3264_v38  ;;  %2435 = vmatpush1.bf16.msra.mxu1 %v3273_v51  ;;  %v1921_v51 = vld [vmem:[%s3472_s0 + $0xf0] sm:$0xff] }
 0x6c2   :  { %v1546_v43 = vpop.f32.mrb[12].mxu0  ;;  %v1617_v54 = vpop.f32.mrb[12].mxu1 }
 0x6c3   :  { %v1622_v56 = vadd.f32 %v1914_v3, %v1546_v43  ;;  %v1548_v60 = vpop.f32.mrb[13].mxu0  ;;  %v1619_v2 = vpop.f32.mrb[13].mxu1  ;;  %v1624_v15 = vadd.f32 %v1916_v52, %v1617_v54 }
 0x6c4   :  { %v1623_v12 = vadd.f32 %v1915_v33, %v1548_v60  ;;  %v1625_v18 = vadd.f32 %v1917_v21, %v1619_v2 }
 0x6c5   :  { %2497 = vtanh.f32 %v1622_v56 }
 0x6c6   :  { %2499 = vtanh.f32 %v1623_v12 }
 0x6c7   :  { %2501 = vtanh.f32 %v1624_v15 }
 0x6c8   :  { %2503 = vtanh.f32 %v1625_v18 }
 0x6cf   :  { %v2498_v34 = vpop.eup %2497 }
 0x6d0   :  { %v1630_v35 = vmul.f32 0.5, %v2498_v34  ;;  %v2500_v46 = vpop.eup %2499 }
 0x6d1   :  { %v1632_v10 = vmul.f32 0.5, %v2500_v46  ;;  %v2502_v14 = vpop.eup %2501 }
 0x6d2   :  { %v1631_v58 = vadd.f32 0.5, %v1630_v35  ;;  %v2504_v48 = vpop.eup %2503 }
 0x6d3   :  { %v1633_v31 = vadd.f32 0.5, %v1632_v10  ;;  %v1634_v13 = vmul.f32 0.5, %v2504_v48 }
 0x6d4   :  { %v1637_v45 = vmul.f32 %v2502_v14, %v1631_v58 }
 0x6d5   :  { %v1636_v29 = vmul.f32 %v1633_v31, %v3399_v28  ;;  %v1635_v63 = vadd.f32 0.5, %v1634_v13 }
 0x6d7   :  { %v1638_v37 = vadd.f32 %v1637_v45, %v1636_v29 }
 0x6d9   :  { %2505 = vtanh.f32 %v1638_v37 }
 0x6e3   :  { %v2506_v1 = vpop.eup %2505 }
 0x6e4   :  { %v1640_v11 = vmul.f32 %v2506_v1, %v1635_v63 }
 0x6e6   :  { %1918 = vst [vmem:[%s3473_s2 + $0x30] sm:$0xff] %v1640_v11  ;;  %1777 = vmatmul.mubr.f32.vlgmr.msra.gmra.mrb[14].mxu0 %v1640_v11  ;;  %1848 = vmatmul.mubr.f32.vlgmr.msra.gmra.mrb[14].mxu1 %v1640_v11 }
 0x7b9   :  { %v1778_v38 = vpop.f32.mrb[14].mxu0  ;;  %v1849_v57 = vpop.f32.mrb[14].mxu1 }
 0x7ba   :  { %v1854_v59 = vadd.f32 %v1919_v9, %v1778_v38  ;;  %v1780_v62 = vpop.f32.mrb[15].mxu0  ;;  %v1851_v6 = vpop.f32.mrb[15].mxu1  ;;  %v1856_v20 = vadd.f32 %v1921_v51, %v1849_v57 }
 0x7bb   :  { %v1855_v16 = vadd.f32 %v1920_v30, %v1780_v62  ;;  %v1857_v8 = vadd.f32 %v1922_v7, %v1851_v6 }
 0x7bc   :  { %2507 = vtanh.f32 %v1854_v59 }
 0x7bd   :  { %2509 = vtanh.f32 %v1855_v16 }
 0x7be   :  { %2511 = vtanh.f32 %v1856_v20 }
 0x7bf   :  { %2513 = vtanh.f32 %v1857_v8 }
 0x7c6   :  { %v2508_v17 = vpop.eup %2507 }
 0x7c7   :  { %v1862_v22 = vmul.f32 0.5, %v2508_v17  ;;  %v2510_v19 = vpop.eup %2509 }
 0x7c8   :  { %v1864_v42 = vmul.f32 0.5, %v2510_v19  ;;  %v2512_v49 = vpop.eup %2511 }
 0x7c9   :  { %v1863_v26 = vadd.f32 0.5, %v1862_v22  ;;  %v2514_v0 = vpop.eup %2513 }
 0x7ca   :  { %v1865_v24 = vadd.f32 0.5, %v1864_v42  ;;  %v1866_v5 = vmul.f32 0.5, %v2514_v0 }
 0x7cb   :  { %v1869_v32 = vmul.f32 %v2512_v49, %v1863_v26 }
 0x7cc   :  { %v1868_v55 = vmul.f32 %v1865_v24, %v1638_v37  ;;  %v1867_v23 = vadd.f32 0.5, %v1866_v5 }
 0x7ce   :  { %v1870_v61 = vadd.f32 %v1869_v32, %v1868_v55 }
 0x7d0   :  { %2515 = vtanh.f32 %v1870_v61  ;;  %1880 = vst [vmem:[%s3474_s3] sm:$0xff] %v1870_v61 }
 0x7da   :  { %v2516_v27 = vpop.eup %2515 }
 0x7db   :  { %v1872_v36 = vmul.f32 %v2516_v27, %v1867_v23 }
 0x7dd   :  { %1923 = vst [vmem:[%s3473_s2 + $0x38] sm:$0xff] %v1872_v36 }

</bundles_post_ra>
